<compile_context>
chip_gen: v5e
topology: v5e:2x2
jax: 0.10.0
libtpu: 0.0.40
codegen_flags: <defaults>
</compile_context>

<pallas_src>
import functools

import jax
import jax.numpy as jnp
from jax.experimental import pallas as pl
from jax.experimental.pallas import tpu as pltpu


def _ws_conv3x3_kernel(x_ref, w_ref, b_ref, o_ref, *, n_rows, row_pitch, K):
    """Fused, pre-scaled 3x3 conv (stride 1) on one flattened, halo'd row slab.

    x_ref: (1, 1, SLAB, Cin)   bf16 zero-padded slab, rows flattened with pitch
                               `row_pitch` = W + 2; SLAB = (TH + K) * row_pitch.
    w_ref: (K, K, Cin, TCout)  bf16, WeightScaler scale already folded in.
    b_ref: (1, TCout)          f32,  WeightScaler scale already folded in.
    o_ref: (1, n_rows, TCout)  n_rows = TH * row_pitch; the last 2 columns of every
                               image row are junk and are dropped by the wrapper.
    """
    cout = o_ref.shape[-1]
    acc = jnp.zeros((n_rows, cout), jnp.float32)
    # 3x3 conv as 9 static row-offset slices + 2-D MXU matmuls (f32 accumulation).
    for ky in range(K):
        for kx in range(K):
            off = ky * row_pitch + kx
            lhs = x_ref[0, 0, off:off + n_rows, :]
            acc = acc + jnp.dot(lhs, w_ref[ky, kx],
                                preferred_element_type=jnp.float32)
    acc = acc + b_ref[...]                       # (1, TCout) broadcast add, f32
    o_ref[0] = acc.astype(o_ref.dtype)


def weight_scaler_conv2d(x_nchw, w_oihw, bias, *, gain=2, block_rows=8,
                         compute_dtype=jnp.bfloat16):
    """WeightScaler(nn.Conv2d(Cin, Cout, 3, stride=1, padding=1, bias=True)).forward.

    x_nchw: (N, Cin, H, W)   w_oihw: (Cout, Cin, 3, 3)   bias: (Cout,)
    Returns (N, Cout, H, W) NCHW, matching PyTorch.
    """
    N, Cin, H, W = x_nchw.shape
    Cout, Cin_w, K, K2 = w_oihw.shape
    assert (K, K2) == (3, 3) and Cin_w == Cin

    # WeightScaler: scale = sqrt(gain / wrapped.weight[0].numel()) = sqrt(gain/(Cin*K*K)).
    # Fold it into the conv weight and bias (exact: (Wx + b)*s == (sW)x + (sb)).
    scale = (gain / (Cin * K * K)) ** 0.5
    w_kkio = jnp.transpose(w_oihw * scale, (2, 3, 1, 0)).astype(compute_dtype)
    b2 = (bias * scale).astype(jnp.float32).reshape(1, Cout)

    # Tile sizes: row tile (divisor of H) and Cout tile.
    th = max(1, min(block_rows, H))
    while H % th:
        th -= 1
    tco = 128 if Cout % 128 == 0 else Cout
    n_row_tiles = H // th
    n_co_tiles = Cout // tco

    # NCHW -> NHWC (bf16); zero-pad 1px left/right/top and K-1 rows at the bottom
    # (1 halo row + spare rows so every shifted flat window stays in bounds).
    x = jnp.transpose(x_nchw, (0, 2, 3, 1)).astype(compute_dtype)
    row_pitch = W + 2
    xp = jnp.pad(x, ((0, 0), (1, K - 1), (1, 1), (0, 0)))      # (N, H+K, W+2, Cin)

    # Gather overlapping halo'd row slabs and flatten each slab's rows so the conv
    # taps inside the kernel are plain static row-offset slices (no reshapes).
    slab_rows = th + K
    row_idx = (jnp.arange(n_row_tiles)[:, None] * th
               + jnp.arange(slab_rows)[None, :])               # (R, th+K)
    slabs = xp[:, row_idx]                                     # (N, R, th+K, W+2, Cin)
    slab_len = slab_rows * row_pitch
    slabs = slabs.reshape(N, n_row_tiles, slab_len, Cin)

    n_rows = th * row_pitch
    out_dtype = x_nchw.dtype

    # Explicit VMEM budget, re-derived from the (lane/sublane-padded) block sizes.
    def _padded_bytes(rows, cols, dtype):
        item = jnp.dtype(dtype).itemsize
        sub = 8 * (4 // item)                                  # 8 (f32) / 16 (bf16)
        return (-(-rows // sub) * sub) * (-(-cols // 128) * 128) * item

    vmem_needed = 2 * (_padded_bytes(slab_len, Cin, compute_dtype)
                       + _padded_bytes(K * K * Cin, tco, compute_dtype)
                       + _padded_bytes(1, tco, jnp.float32)
                       + _padded_bytes(n_rows, tco, out_dtype))
    vmem_limit = int(min(max(2 * vmem_needed + (2 << 20), 16 << 20), 64 << 20))

    kernel = functools.partial(_ws_conv3x3_kernel, n_rows=n_rows,
                               row_pitch=row_pitch, K=K)

    out_flat = pl.pallas_call(
        kernel,
        out_shape=jax.ShapeDtypeStruct((N, H * row_pitch, Cout), out_dtype),
        grid_spec=pltpu.PrefetchScalarGridSpec(
            num_scalar_prefetch=0,
            grid=(N, n_co_tiles, n_row_tiles),                 # row tiles innermost
            in_specs=[
                # Halo'd, flattened row slab for this (batch, row-tile).
                pl.BlockSpec((1, 1, slab_len, Cin), lambda n, co, r: (n, r, 0, 0)),
                # Weights / bias: constant across n and r -> re-fetched only per co.
                pl.BlockSpec((K, K, Cin, tco), lambda n, co, r: (0, 0, 0, co)),
                pl.BlockSpec((1, tco), lambda n, co, r: (0, co)),
            ],
            out_specs=pl.BlockSpec((1, n_rows, tco), lambda n, co, r: (n, r, co)),
        ),
        compiler_params=pltpu.CompilerParams(
            dimension_semantics=("parallel", "parallel", "parallel"),
            vmem_limit_bytes=vmem_limit,
        ),
    )(slabs, w_kkio, b2)

    # Drop the 2 junk columns per image row; back to NCHW for the PyTorch interface.
    out = out_flat.reshape(N, H, row_pitch, Cout)[:, :, :W, :]
    return jnp.transpose(out, (0, 3, 1, 2))


def _reference_forward(x_nchw, w_oihw, bias, *, gain=2, compute_dtype=jnp.bfloat16):
    """Pure-JAX reference: Conv2d(k=3, s=1, p=1) output times the WeightScaler scale."""
    Cout, Cin, K, _ = w_oihw.shape
    scale = (gain / (Cin * K * K)) ** 0.5
    out = jax.lax.conv_general_dilated(
        x_nchw.astype(compute_dtype),
        (w_oihw * scale).astype(compute_dtype),
        window_strides=(1, 1), padding=((1, 1), (1, 1)),
        dimension_numbers=("NCHW", "OIHW", "NCHW"),
        preferred_element_type=jnp.float32)
    out = out + (bias * scale).astype(jnp.float32)[None, :, None, None]
    return out.astype(x_nchw.dtype)


if __name__ == "__main__":
    # WeightScaler(nn.Conv2d(4, 8, 3, padding=1), gain=2) at small PGAN-like shapes.
    N, Cin, Cout, H, W = 2, 4, 8, 16, 16

    key = jax.random.PRNGKey(0)
    k_x, k_w, k_b = jax.random.split(key, 3)
    x = jax.random.normal(k_x, (N, Cin, H, W), dtype=jnp.float32)
    w = jax.random.normal(k_w, (Cout, Cin, 3, 3), dtype=jnp.float32) * 0.1
    b = jax.random.normal(k_b, (Cout,), dtype=jnp.float32) * 0.1

    fwd = jax.jit(functools.partial(weight_scaler_conv2d, gain=2))
    y = fwd(x, w, b)
    jax.block_until_ready(y)

    y_ref = _reference_forward(x, w, b, gain=2)
    assert y.shape == (N, Cout, H, W), y.shape
    max_err = float(jnp.max(jnp.abs(y - y_ref)))
    assert jnp.allclose(y, y_ref, atol=1e-2, rtol=1e-2), f"mismatch vs reference: {max_err}"

    print("KERNEL_OK")
</pallas_src>

<mosaic_0001>
module attributes {stable_mosaic.version = 11 : i64} {
  func.func @_ws_conv3x3_kernel(%arg0: i32, %arg1: i32, %arg2: i32, %arg3: memref<1x1x198x4xbf16, #tpu.memory_space<vmem>>, %arg4: memref<3x3x4x8xbf16, #tpu.memory_space<vmem>>, %arg5: memref<1x8xf32, #tpu.memory_space<vmem>>, %arg6: memref<1x144x8xf32, #tpu.memory_space<vmem>>) attributes {dimension_semantics = [#tpu.dimension_semantics<parallel>, #tpu.dimension_semantics<parallel>, #tpu.dimension_semantics<parallel>], iteration_bounds = array<i64: 2, 1, 2>, scalar_prefetch = 0 : i64, scratch_operands = 0 : i64, tpu.core_type = #tpu.core_type<tc>, window_params = [{transform_indices = @transform_0, window_bounds = array<i64: 1, 1, 198, 4>}, {transform_indices = @transform_1, window_bounds = array<i64: 3, 3, 4, 8>}, {transform_indices = @transform_2, window_bounds = array<i64: 1, 8>}, {transform_indices = @transform_3, window_bounds = array<i64: 1, 144, 8>}]} {
    %cst = arith.constant 0.000000e+00 : f32
    %0 = vector.broadcast %cst : f32 to vector<144x8xf32>
    %c0 = arith.constant 0 : index
    %c0_0 = arith.constant 0 : index
    %c0_1 = arith.constant 0 : index
    %c0_2 = arith.constant 0 : index
    %1 = vector.load %arg3[%c0, %c0_0, %c0_1, %c0_2] : memref<1x1x198x4xbf16, #tpu.memory_space<vmem>>, vector<1x1x144x4xbf16>
    %2 = vector.shape_cast %1 : vector<1x1x144x4xbf16> to vector<144x4xbf16>
    %c0_3 = arith.constant 0 : index
    %c0_4 = arith.constant 0 : index
    %c0_5 = arith.constant 0 : index
    %c0_6 = arith.constant 0 : index
    %3 = vector.load %arg4[%c0_3, %c0_4, %c0_5, %c0_6] : memref<3x3x4x8xbf16, #tpu.memory_space<vmem>>, vector<1x1x4x8xbf16>
    %4 = vector.shape_cast %3 : vector<1x1x4x8xbf16> to vector<4x8xbf16>
    %cst_7 = arith.constant dense<0.000000e+00> : vector<144x8xf32>
    %5 = tpu.matmul %2, %4, %cst_7 {dimension_numbers = #tpu.dot_dimension_numbers<[1], [0], [0], [1], [0, 0, 1, 1], [], []>} : vector<144x4xbf16>, vector<4x8xbf16>, vector<144x8xf32> -> vector<144x8xf32>
    %6 = arith.addf %0, %5 : vector<144x8xf32>
    %c0_8 = arith.constant 0 : index
    %c0_9 = arith.constant 0 : index
    %c1 = arith.constant 1 : index
    %c0_10 = arith.constant 0 : index
    %7 = vector.load %arg3[%c0_8, %c0_9, %c1, %c0_10] : memref<1x1x198x4xbf16, #tpu.memory_space<vmem>>, vector<1x1x144x4xbf16>
    %8 = vector.shape_cast %7 : vector<1x1x144x4xbf16> to vector<144x4xbf16>
    %c0_11 = arith.constant 0 : index
    %c1_12 = arith.constant 1 : index
    %c0_13 = arith.constant 0 : index
    %c0_14 = arith.constant 0 : index
    %9 = vector.load %arg4[%c0_11, %c1_12, %c0_13, %c0_14] : memref<3x3x4x8xbf16, #tpu.memory_space<vmem>>, vector<1x1x4x8xbf16>
    %10 = vector.shape_cast %9 : vector<1x1x4x8xbf16> to vector<4x8xbf16>
    %cst_15 = arith.constant dense<0.000000e+00> : vector<144x8xf32>
    %11 = tpu.matmul %8, %10, %cst_15 {dimension_numbers = #tpu.dot_dimension_numbers<[1], [0], [0], [1], [0, 0, 1, 1], [], []>} : vector<144x4xbf16>, vector<4x8xbf16>, vector<144x8xf32> -> vector<144x8xf32>
    %12 = arith.addf %6, %11 : vector<144x8xf32>
    %c0_16 = arith.constant 0 : index
    %c0_17 = arith.constant 0 : index
    %c2 = arith.constant 2 : index
    %c0_18 = arith.constant 0 : index
    %13 = vector.load %arg3[%c0_16, %c0_17, %c2, %c0_18] : memref<1x1x198x4xbf16, #tpu.memory_space<vmem>>, vector<1x1x144x4xbf16>
    %14 = vector.shape_cast %13 : vector<1x1x144x4xbf16> to vector<144x4xbf16>
    %c0_19 = arith.constant 0 : index
    %c2_20 = arith.constant 2 : index
    %c0_21 = arith.constant 0 : index
    %c0_22 = arith.constant 0 : index
    %15 = vector.load %arg4[%c0_19, %c2_20, %c0_21, %c0_22] : memref<3x3x4x8xbf16, #tpu.memory_space<vmem>>, vector<1x1x4x8xbf16>
    %16 = vector.shape_cast %15 : vector<1x1x4x8xbf16> to vector<4x8xbf16>
    %cst_23 = arith.constant dense<0.000000e+00> : vector<144x8xf32>
    %17 = tpu.matmul %14, %16, %cst_23 {dimension_numbers = #tpu.dot_dimension_numbers<[1], [0], [0], [1], [0, 0, 1, 1], [], []>} : vector<144x4xbf16>, vector<4x8xbf16>, vector<144x8xf32> -> vector<144x8xf32>
    %18 = arith.addf %12, %17 : vector<144x8xf32>
    %c0_24 = arith.constant 0 : index
    %c0_25 = arith.constant 0 : index
    %c18 = arith.constant 18 : index
    %c0_26 = arith.constant 0 : index
    %19 = vector.load %arg3[%c0_24, %c0_25, %c18, %c0_26] : memref<1x1x198x4xbf16, #tpu.memory_space<vmem>>, vector<1x1x144x4xbf16>
    %20 = vector.shape_cast %19 : vector<1x1x144x4xbf16> to vector<144x4xbf16>
    %c1_27 = arith.constant 1 : index
    %c0_28 = arith.constant 0 : index
    %c0_29 = arith.constant 0 : index
    %c0_30 = arith.constant 0 : index
    %21 = vector.load %arg4[%c1_27, %c0_28, %c0_29, %c0_30] : memref<3x3x4x8xbf16, #tpu.memory_space<vmem>>, vector<1x1x4x8xbf16>
    %22 = vector.shape_cast %21 : vector<1x1x4x8xbf16> to vector<4x8xbf16>
    %cst_31 = arith.constant dense<0.000000e+00> : vector<144x8xf32>
    %23 = tpu.matmul %20, %22, %cst_31 {dimension_numbers = #tpu.dot_dimension_numbers<[1], [0], [0], [1], [0, 0, 1, 1], [], []>} : vector<144x4xbf16>, vector<4x8xbf16>, vector<144x8xf32> -> vector<144x8xf32>
    %24 = arith.addf %18, %23 : vector<144x8xf32>
    %c0_32 = arith.constant 0 : index
    %c0_33 = arith.constant 0 : index
    %c19 = arith.constant 19 : index
    %c0_34 = arith.constant 0 : index
    %25 = vector.load %arg3[%c0_32, %c0_33, %c19, %c0_34] : memref<1x1x198x4xbf16, #tpu.memory_space<vmem>>, vector<1x1x144x4xbf16>
    %26 = vector.shape_cast %25 : vector<1x1x144x4xbf16> to vector<144x4xbf16>
    %c1_35 = arith.constant 1 : index
    %c1_36 = arith.constant 1 : index
    %c0_37 = arith.constant 0 : index
    %c0_38 = arith.constant 0 : index
    %27 = vector.load %arg4[%c1_35, %c1_36, %c0_37, %c0_38] : memref<3x3x4x8xbf16, #tpu.memory_space<vmem>>, vector<1x1x4x8xbf16>
    %28 = vector.shape_cast %27 : vector<1x1x4x8xbf16> to vector<4x8xbf16>
    %cst_39 = arith.constant dense<0.000000e+00> : vector<144x8xf32>
    %29 = tpu.matmul %26, %28, %cst_39 {dimension_numbers = #tpu.dot_dimension_numbers<[1], [0], [0], [1], [0, 0, 1, 1], [], []>} : vector<144x4xbf16>, vector<4x8xbf16>, vector<144x8xf32> -> vector<144x8xf32>
    %30 = arith.addf %24, %29 : vector<144x8xf32>
    %c0_40 = arith.constant 0 : index
    %c0_41 = arith.constant 0 : index
    %c20 = arith.constant 20 : index
    %c0_42 = arith.constant 0 : index
    %31 = vector.load %arg3[%c0_40, %c0_41, %c20, %c0_42] : memref<1x1x198x4xbf16, #tpu.memory_space<vmem>>, vector<1x1x144x4xbf16>
    %32 = vector.shape_cast %31 : vector<1x1x144x4xbf16> to vector<144x4xbf16>
    %c1_43 = arith.constant 1 : index
    %c2_44 = arith.constant 2 : index
    %c0_45 = arith.constant 0 : index
    %c0_46 = arith.constant 0 : index
    %33 = vector.load %arg4[%c1_43, %c2_44, %c0_45, %c0_46] : memref<3x3x4x8xbf16, #tpu.memory_space<vmem>>, vector<1x1x4x8xbf16>
    %34 = vector.shape_cast %33 : vector<1x1x4x8xbf16> to vector<4x8xbf16>
    %cst_47 = arith.constant dense<0.000000e+00> : vector<144x8xf32>
    %35 = tpu.matmul %32, %34, %cst_47 {dimension_numbers = #tpu.dot_dimension_numbers<[1], [0], [0], [1], [0, 0, 1, 1], [], []>} : vector<144x4xbf16>, vector<4x8xbf16>, vector<144x8xf32> -> vector<144x8xf32>
    %36 = arith.addf %30, %35 : vector<144x8xf32>
    %c0_48 = arith.constant 0 : index
    %c0_49 = arith.constant 0 : index
    %c36 = arith.constant 36 : index
    %c0_50 = arith.constant 0 : index
    %37 = vector.load %arg3[%c0_48, %c0_49, %c36, %c0_50] : memref<1x1x198x4xbf16, #tpu.memory_space<vmem>>, vector<1x1x144x4xbf16>
    %38 = vector.shape_cast %37 : vector<1x1x144x4xbf16> to vector<144x4xbf16>
    %c2_51 = arith.constant 2 : index
    %c0_52 = arith.constant 0 : index
    %c0_53 = arith.constant 0 : index
    %c0_54 = arith.constant 0 : index
    %39 = vector.load %arg4[%c2_51, %c0_52, %c0_53, %c0_54] : memref<3x3x4x8xbf16, #tpu.memory_space<vmem>>, vector<1x1x4x8xbf16>
    %40 = vector.shape_cast %39 : vector<1x1x4x8xbf16> to vector<4x8xbf16>
    %cst_55 = arith.constant dense<0.000000e+00> : vector<144x8xf32>
    %41 = tpu.matmul %38, %40, %cst_55 {dimension_numbers = #tpu.dot_dimension_numbers<[1], [0], [0], [1], [0, 0, 1, 1], [], []>} : vector<144x4xbf16>, vector<4x8xbf16>, vector<144x8xf32> -> vector<144x8xf32>
    %42 = arith.addf %36, %41 : vector<144x8xf32>
    %c0_56 = arith.constant 0 : index
    %c0_57 = arith.constant 0 : index
    %c37 = arith.constant 37 : index
    %c0_58 = arith.constant 0 : index
    %43 = vector.load %arg3[%c0_56, %c0_57, %c37, %c0_58] : memref<1x1x198x4xbf16, #tpu.memory_space<vmem>>, vector<1x1x144x4xbf16>
    %44 = vector.shape_cast %43 : vector<1x1x144x4xbf16> to vector<144x4xbf16>
    %c2_59 = arith.constant 2 : index
    %c1_60 = arith.constant 1 : index
    %c0_61 = arith.constant 0 : index
    %c0_62 = arith.constant 0 : index
    %45 = vector.load %arg4[%c2_59, %c1_60, %c0_61, %c0_62] : memref<3x3x4x8xbf16, #tpu.memory_space<vmem>>, vector<1x1x4x8xbf16>
    %46 = vector.shape_cast %45 : vector<1x1x4x8xbf16> to vector<4x8xbf16>
    %cst_63 = arith.constant dense<0.000000e+00> : vector<144x8xf32>
    %47 = tpu.matmul %44, %46, %cst_63 {dimension_numbers = #tpu.dot_dimension_numbers<[1], [0], [0], [1], [0, 0, 1, 1], [], []>} : vector<144x4xbf16>, vector<4x8xbf16>, vector<144x8xf32> -> vector<144x8xf32>
    %48 = arith.addf %42, %47 : vector<144x8xf32>
    %c0_64 = arith.constant 0 : index
    %c0_65 = arith.constant 0 : index
    %c38 = arith.constant 38 : index
    %c0_66 = arith.constant 0 : index
    %49 = vector.load %arg3[%c0_64, %c0_65, %c38, %c0_66] : memref<1x1x198x4xbf16, #tpu.memory_space<vmem>>, vector<1x1x144x4xbf16>
    %50 = vector.shape_cast %49 : vector<1x1x144x4xbf16> to vector<144x4xbf16>
    %c2_67 = arith.constant 2 : index
    %c2_68 = arith.constant 2 : index
    %c0_69 = arith.constant 0 : index
    %c0_70 = arith.constant 0 : index
    %51 = vector.load %arg4[%c2_67, %c2_68, %c0_69, %c0_70] : memref<3x3x4x8xbf16, #tpu.memory_space<vmem>>, vector<1x1x4x8xbf16>
    %52 = vector.shape_cast %51 : vector<1x1x4x8xbf16> to vector<4x8xbf16>
    %cst_71 = arith.constant dense<0.000000e+00> : vector<144x8xf32>
    %53 = tpu.matmul %50, %52, %cst_71 {dimension_numbers = #tpu.dot_dimension_numbers<[1], [0], [0], [1], [0, 0, 1, 1], [], []>} : vector<144x4xbf16>, vector<4x8xbf16>, vector<144x8xf32> -> vector<144x8xf32>
    %54 = arith.addf %48, %53 : vector<144x8xf32>
    %c0_72 = arith.constant 0 : index
    %c0_73 = arith.constant 0 : index
    %55 = vector.load %arg5[%c0_72, %c0_73] : memref<1x8xf32, #tpu.memory_space<vmem>>, vector<1x8xf32>
    %56 = vector.broadcast %55 : vector<1x8xf32> to vector<144x8xf32>
    %57 = arith.addf %54, %56 : vector<144x8xf32>
    %c0_74 = arith.constant 0 : index
    %c0_75 = arith.constant 0 : index
    %c0_76 = arith.constant 0 : index
    %58 = vector.load %arg6[%c0_74, %c0_75, %c0_76] : memref<1x144x8xf32, #tpu.memory_space<vmem>>, vector<1x144x8xf32>
    %59 = vector.shape_cast %58 : vector<1x144x8xf32> to vector<144x8xf32>
    %60 = vector.shape_cast %57 : vector<144x8xf32> to vector<1x144x8xf32>
    tpu.vector_store %arg6[%c0_74, %c0_75, %c0_76], %60 {strides = array<i32>} : memref<1x144x8xf32, #tpu.memory_space<vmem>>, vector<1x144x8xf32>,
    return
  }
  func.func @transform_0(%arg0: i32, %arg1: i32, %arg2: i32) -> (i32, i32, i32, i32) {
    %c0_i32 = arith.constant 0 : i32
    %c0_i32_0 = arith.constant 0 : i32
    %c0_i32_1 = arith.constant 0 : i32
    return %arg0, %arg2, %c0_i32, %c0_i32_0 : i32, i32, i32, i32
  }
  func.func @transform_1(%arg0: i32, %arg1: i32, %arg2: i32) -> (i32, i32, i32, i32) {
    %c0_i32 = arith.constant 0 : i32
    %c0_i32_0 = arith.constant 0 : i32
    %c0_i32_1 = arith.constant 0 : i32
    %c0_i32_2 = arith.constant 0 : i32
    return %c0_i32, %c0_i32_0, %c0_i32_1, %arg1 : i32, i32, i32, i32
  }
  func.func @transform_2(%arg0: i32, %arg1: i32, %arg2: i32) -> (i32, i32) {
    %c0_i32 = arith.constant 0 : i32
    %c0_i32_0 = arith.constant 0 : i32
    return %c0_i32, %arg1 : i32, i32
  }
  func.func @transform_3(%arg0: i32, %arg1: i32, %arg2: i32) -> (i32, i32, i32) {
    %c0_i32 = arith.constant 0 : i32
    return %arg0, %arg2, %arg1 : i32, i32, i32
  }
}

</mosaic_0001>

<bundles_post_ra>
// kernel: weight_scaler_conv2d.1
= control target key start
LH: loop header
LB: loop body
LE: loop exit
PB: predicated region body
PF: predicated region fallthrough
CT: control target
= control target key end

     0   :  { %s2231_s12 = smov 0   ;;  %s2233_s13 = smov 0   ;;  %s2921_s0 = inlined_call_operand.vmem [shape: bf16[2,2,198,4], index: 0, kind: input, shape index: {}]   ;;  %s2922_s1 = inlined_call_operand.vmem [shape: bf16[3,3,4,8], index: 1, kind: input, shape index: {}]   ;;  %s2923_s2 = inlined_call_operand.vmem [shape: f32[1,8], index: 2, kind: input, shape index: {}]   ;;  %s2924_s3 = inlined_call_operand.vmem [shape: f32[2,288,8], index: 3, kind: output, shape index: {}]  }
   0x1   :  { %s2235_s14 = smov 0   ;;  %s2237_s15 = smov 0  }
   0x2   :  { %s2239_s16 = smov 0  }
   0x3 LB: > { %s25_s17 = sadd.s32 1, %s2201_s14  ;;  %s32_s18 = sadd.s32 1, %s2205_s15  ;;  %s2209_s16 = sphi %s2239_s16, %s13_s16   ;;  %s2205_s15 = sphi %s2237_s15, %s2928_s15   ;;  %s2201_s14 = sphi %s2235_s14, %s2927_s14   ;;  %s2197_s13 = sphi %s2233_s13, %s2926_s13   ;;  %s2193_s12 = sphi %s2231_s12, %s2925_s12  }
   0x4   : > { %p26_p0 = scmp.ge.s32.totalorder %s25_s17, 2  ;;  %p1903_p1 = scmp.ge.s32.totalorder %s2209_s16, 1 }
   0x5   : > { %p183_p2 = scmp.lt.s32.totalorder %s2209_s16, 5 }
   0x6   : > { %s2930_s17 = smov (%p26_p0, %s25_s17), 0  ;;  %s2932_s18 = smov (!%p26_p0, %s32_s18), %s2205_s15 }
   0x7   : > { %p184_p3 = pnand %p1903_p1, %p183_p2  ;;  %p34_p4 = scmp.ge.s32.totalorder %s2932_s18, 2 }
   0x8   : > { %p225_p5 = scmp.lt.s32.totalorder (!%p184_p3), %s2197_s13, 1  ;;  %p227_p6 = scmp.lt.s32.totalorder (!%p184_p3), %s2193_s12, 1 }
   0x9   : > { %s2934_s18 = smov (%p34_p4, %s2932_s18), 0  ;;  %187 = sbr.rel (%p184_p3) target bundleno = 500 (0x1f4), region = 32 }
   0xe   : > { %v1906_v0 = vld [vmem:[%s2922_s1 + $0x2] sm:$0x3]  ;;  %vm430_vm0 = vcmask 1041408   ;;  %v1957_v2 = vld [vmem:[%s2922_s1 + $0x4] sm:$0x3]  ;;  %s2936_s13 = smov (!%p225_p5, %s2197_s13), 1 }
   0xf   : > { %v432_v1 = vsel %vm430_vm0, %v1906_v0, 0  ;;  %v617_v3 = vsel %vm430_vm0, %v1957_v2, 0  ;;  %v273_v4 = vld [vmem:[%s2922_s1] sm:$0x3]  ;;  %s228_s25 = scalar_select %p227_p6, %s2193_s12, 1  ;;  %vm402_vm2 = vcmask 31744  }
  0x10   : > { %2124 = vmatpush.bf16.msra.mxu1 %v432_v1  ;;  %2125 = vmatpush.bf16.msra.mxu2 %v432_v1  ;;  %v507_v5 = vsel %vm430_vm0, %v273_v4, 0  ;;  %v1967_v6 = vld [vmem:[%s2922_s1 + $0x6] sm:$0x3]  ;;  %s2128_s28 = smul.u32 50, %s2936_s13  ;;  %vm325_vm1 = vsmask.f32 7424 }
  0x11   : > { %2126 = vmatpush.bf16.msra.mxu3 %v432_v1  ;;  %v807_v7 = vsel %vm430_vm0, %v1967_v6, 0  ;;  %441 = vmatpush.bf16.msra.mxu0 %v432_v1  ;;  %s2127_s29 = smul.u32 25, %s228_s25  ;;  %v2009_v41 = vld [vmem:[%s2922_s1 + $0x8] sm:$0x3]  ;;  %vm887_vm3 = vsmask.f32 6400 }
  0x12   : > { %v1005_v51 = vsel %vm430_vm0, %v2009_v41, 0  ;;  %vm569_vm4 = vcmask 1046528   ;;  %vm1601_vm5 = vcmask 1044480   ;;  %vm1403_vm6 = vsmask.f32 5376  ;;  %s241_s25 = smul.u32 18, %s2193_s12 }
  0x13   : > { %s231_s30 = sadd.s32 %s2128_s28, %s2127_s29  ;;  %vm1085_vm7 = vcmask 1045504   ;;  %s2129_s12 = smul.u32 36, %s2936_s13  ;;  %vm1745_vm8 = vcmask 64512  }
  0x14   : > { %626 = vmatpush.bf16.msrb.mxu2 %v617_v3  ;;  %516 = vmatpush.bf16.msrb.mxu1 %v507_v5  ;;  %s1904_s4 = sshll.u32 %s231_s30, 2  ;;  %p244_p7 = scmp.lt.s32.totalorder %s241_s25, 35 }
  0x15   : > { %816 = vmatpush.bf16.msrb.mxu3 %v807_v7  ;;  %s2287_s7 = scalar_lea.vmem %s2921_s0, %s1904_s4  ;;  %1014 = vmatpush.bf16.msrb.mxu0 %v1005_v51 }
  0x16   : > { %v2290_v8 = vld [vmem:[%s2287_s7 + $0x8] sm:$0xff]  ;;  %v2293_v9 = vld [vmem:[%s2287_s7 + $0x10] sm:$0xff]  ;;  %v2296_v10 = vld [vmem:[%s2287_s7 + $0x20] sm:$0xff]  ;;  %s2938_s25 = smov (!%p244_p7, %s241_s25), 35 }
  0x17   : > { %v2299_v11 = vld [vmem:[%s2287_s7 + $0x28] sm:$0xff]  ;;  %v2302_v12 = vld [vmem:[%s2287_s7 + $0x38] sm:$0xff]  ;;  %v2305_v13 = vld [vmem:[%s2287_s7 + $0x40] sm:$0xff]  ;;  %v334_v14 = vshll.u32 %v2290_v8, 16  ;;  %v338_v15 = vshrl.u32 %v2290_v8, 16  ;;  %v342_v16 = vshll.u32 %v2293_v9, 16  ;;  %s250_s26 = sadd.s32 %s2129_s12, %s2938_s25 }
  0x18   : > { %v358_v17 = vshll.u32 %v2296_v10, 16  ;;  %v362_v18 = vshrl.u32 %v2296_v10, 16  ;;  %v366_v19 = vshll.u32 %v2299_v11, 16  ;;  %v382_v20 = vshll.u32 %v2302_v12, 16  ;;  %v274_v28 = vld [vmem:[%s2287_s7 + $0x48] sm:$0x1] }
  0x19   : > { %v386_v21 = vshrl.u32 %v2302_v12, 16  ;;  %v336_v22 = vrot.slane %v334_v14, 1  ;;  %v344_v23 = vrot.slane %v342_v16, 1  ;;  %v390_v25 = vshll.u32 %v2305_v13, 16  ;;  %v2326_v35 = vld [vmem:[%s2287_s7 + $0x18] sm:$0xff]  ;;  %v2329_v37 = vld [vmem:[%s2287_s7] sm:$0xff]  }
  0x1a   : > { %v2315_v24 = vrot.slane %v358_v17, 1  ;;  %v368_v26 = vrot.slane %v366_v19, 1  ;;  %v2318_v27 = vrot.slane %v382_v20, 1  ;;  %v314_v36 = vunpack.c.l.b16 %v274_v28  ;;  %v2335_v39 = vld [vmem:[%s2287_s7 + $0x30] sm:$0xff]  ;;  %v691_v44 = vld [vmem:[%s2287_s7 + $0x8] sm:$0xe] }
  0x1b   : > { %v340_v29 = vor.u32 %v338_v15, %v336_v22  ;;  %v392_v31 = vrot.slane %v390_v25, 1  ;;  %v327_v42 = vshrl.u32 %v2329_v37, 16  ;;  %v329_v43 = vshll.u32 %v2329_v37, 16  ;;  %v2347_v45 = vld [vmem:[%s2287_s7 + $0xc] sm:$0xf]  ;;  %v2360_v0 = vld [vmem:[%s2287_s7 + $0x10] sm:$0xff] }
  0x1c   : > { %v364_v30 = vor.u32 %v362_v18, %v2315_v24  ;;  %v388_v32 = vor.u32 %v386_v21, %v2318_v27  ;;  %v2338_v40 = vpack.c.b16 %v314_v36, %v314_v36  ;;  %v346_v46 = vshrl.u32 %v2293_v9, 16  ;;  %v2029_v19 = vld [vmem:[%s2922_s1 + $0xc] sm:$0x3]  ;;  %v2071_v20 = vld [vmem:[%s2922_s1 + $0xe] sm:$0x3]  ;;  %s1905_s27 = sshll.u32 %s250_s26, 3 }
  0x1d   : > { %v345_v33 = vsel %vm325_vm1, %v340_v29, %v344_v23  ;;  %v350_v47 = vshll.u32 %v2326_v35, 16  ;;  %v370_v48 = vshrl.u32 %v2299_v11, 16  ;;  %v374_v49 = vshll.u32 %v2335_v39, 16  ;;  %v2081_v29 = vld [vmem:[%s2922_s1 + $0x10] sm:$0x3]  ;;  %s2833_s4 = scalar_lea.vmem %s2924_s3, %s1905_s27 }
  0x1e   : > { %v369_v34 = vsel %vm325_vm1, %v364_v30, %v368_v26  ;;  %1940 = vmatmul.msk.bf16.vlgmr.msra.gmra.mxu1 %vm402_vm2, %v345_v33  ;;  %v393_v38 = vsel %vm325_vm1, %v388_v32, %v392_v31  ;;  %v331_v50 = vrot.slane %v329_v43, 1  ;;  %v394_v52 = vshrl.u32 %v2305_v13, 16  ;;  %v2121_v51 = vld [vmem:[%s2287_s7] sm:$0xf0] }
  0x1f   : > { %1943 = vmatmul.msk.bf16.vlgmr.msra.gmra.mxu2 %vm402_vm2, %v369_v34  ;;  %1946 = vmatmul.msk.bf16.vlgmr.msra.gmra.mxu3 %vm402_vm2, %v393_v38  ;;  %v398_v53 = vshll.u32 %v2338_v40, 16  ;;  %v731_v54 = vunpack.c.l.b16 %v691_v44  ;;  %v732_v55 = vunpack.c.l.b16 %v2347_v45  ;;  %v348_v57 = vor.u32 %v346_v46, %v344_v23  ;;  %v2019_v23 = vld [vmem:[%s2922_s1 + $0xa] sm:$0x3]  ;;  %v2393_v38 = vld [vmem:[%s2287_s7 + $0x18] sm:$0xff] }
  0x20   : > { %v332_v56 = vor.u32 %v331_v50, %v327_v42  ;;  %v352_v58 = vrot.slane %v350_v47, 1  ;;  %v372_v59 = vor.u32 %v370_v48, %v368_v26  ;;  %v376_v61 = vrot.slane %v374_v49, 1 }
  0x21   : > { %v396_v62 = vor.u32 %v394_v52, %v392_v31  ;;  %v400_v63 = vrot.slane %v398_v53, 1  ;;  %v750_v1 = vpack.c.b16 %v732_v55, %v731_v54  ;;  %v897_v4 = vshrl.u32 %v2360_v0, 16  ;;  %v2122_v52 = vld [vmem:[%s2287_s7] sm:$0xe] }
  0x22   : > { %v337_v60 = vsel %vm325_vm1, %v332_v56, %v336_v22  ;;  %v900_v5 = vshll.u32 %v2360_v0, 16  ;;  %v353_v6 = vsel %vm325_vm1, %v348_v57, %v352_v58  ;;  %v377_v7 = vsel %vm325_vm1, %v372_v59, %v376_v61 }
  0x23   : > { %1939 = vmatmul.msk.bf16.vlgmr.msra.gmra.mxu0 %vm402_vm2, %v337_v60  ;;  %v889_v2 = vshrl.u32 %v750_v1, 16  ;;  %v892_v3 = vshll.u32 %v750_v1, 16  ;;  %v401_v14 = vsel %vm325_vm1, %v396_v62, %v400_v63  ;;  %v899_v17 = vrot.slane %v897_v4, 1 }
  0x24   : > { %v902_v18 = vrot.slane %v900_v5, 2  ;;  %v1323_v21 = vsel %vm430_vm0, %v2029_v19, 0  ;;  %v1521_v22 = vsel %vm430_vm0, %v2071_v20, 0  ;;  %v1133_v28 = vsel %vm430_vm0, %v2019_v23, 0  ;;  %v2427_v5 = vld [vmem:[%s2287_s7 + $0x28] sm:$0xff] }
  0x25   : > { %v891_v15 = vrot.slane %v889_v2, 1  ;;  %v894_v16 = vrot.slane %v892_v3, 2  ;;  %1332 = vmatpush.bf16.msra.mxu2 %v1323_v21  ;;  %1530 = vmatpush.bf16.msra.mxu3 %v1521_v22  ;;  %v1649_v30 = vsel %vm430_vm0, %v2081_v29, 0  ;;  %v354_v31 = vshrl.u32 %v2326_v35, 16  ;;  %v2442_v21 = vld [vmem:[%s2287_s7 + $0x30] sm:$0xff] }
  0x26   : > { %v903_v26 = vor.u32 %v902_v18, %v899_v17  ;;  %1142 = vmatpush.bf16.msra.mxu1 %v1133_v28  ;;  %1658 = vmatpush.bf16.msra.mxu0 %v1649_v30  ;;  %v378_v32 = vshrl.u32 %v2335_v39, 16  ;;  %v760_v41 = vrot.slane %v750_v1, 1  ;;  %v761_v42 = vrot.slane %v2360_v0, 1 }
  0x27   : > { %v895_v25 = vor.u32 %v894_v16, %v891_v15  ;;  %v356_v34 = vor.u32 %v354_v31, %v352_v58  ;;  %v906_v43 = vshrl.u32 %v2393_v38, 16  ;;  %v909_v44 = vshll.u32 %v2393_v38, 16 }
  0x28   : > { %v380_v36 = vor.u32 %v378_v32, %v376_v61  ;;  %v762_v48 = vsel %vm569_vm4, %v760_v41, %v761_v42  ;;  %v2123_v54 = vor.u32 %v2122_v52, %v2121_v51  ;;  %v571_v57 = vrot.slane %v2290_v8, 1 }
  0x29   : > { %v904_v33 = vsel %vm887_vm3, %v895_v25, %v903_v26  ;;  %v361_v46 = vsel %vm325_vm1, %v356_v34, %v2315_v24  ;;  %v908_v49 = vrot.slane %v906_v43, 1  ;;  %v911_v50 = vrot.slane %v909_v44, 2 }
  0x2a   : > { %v385_v47 = vsel %vm325_vm1, %v380_v36, %v2318_v27  ;;  %v570_v56 = vrot.slane %v2123_v54, 1  ;;  %v2412_v27 = vld [vmem:[%s2287_s7 + $0x20] sm:$0xff]  ;;  %v763_v58 = vrot.slane %v2393_v38, 1  ;;  %v573_v4 = vrot.slane %v2293_v9, 1 }
  0x2b   : > { %v912_v53 = vor.u32 %v911_v50, %v908_v49  ;;  %v915_v59 = vshrl.u32 %v2412_v27, 16  ;;  %v918_v60 = vshll.u32 %v2412_v27, 16  ;;  %v575_v20 = vrot.slane %v2326_v35, 1  ;;  %v2472_v49 = vld [vmem:[%s2287_s7 + $0x40] sm:$0xff] }
  0x2c   : > { %v572_v61 = vsel %vm569_vm4, %v570_v56, %v571_v57  ;;  %v764_v62 = vsel %vm569_vm4, %v761_v42, %v763_v58  ;;  %v767_v22 = vrot.slane %v2427_v5, 1  ;;  %v933_v23 = vshrl.u32 %v2442_v21, 16 }
  0x2d   : > { %v913_v24 = vsel %vm887_vm3, %v903_v26, %v912_v53  ;;  %v917_v63 = vrot.slane %v915_v59, 1  ;;  %v920_v1 = vrot.slane %v918_v60, 2  ;;  %v576_v25 = vsel %vm569_vm4, %v573_v4, %v575_v20  ;;  %v2487_v59 = vld [vmem:[%s2287_s7 + $0x48] sm:$0xff] }
  0x2e   : > { %1941 = vmatmul.msk.bf16.gmra.mxu1 %vm402_vm2, %v353_v6  ;;  %v765_v6 = vrot.slane %v2412_v27, 1  ;;  %v935_v28 = vrot.slane %v933_v23, 1  ;;  %v577_v32 = vrot.slane %v2296_v10, 1  ;;  %v769_v34 = vrot.slane %v2442_v21, 1 }
  0x2f   : > { %1944 = vmatmul.msk.bf16.gmra.mxu2 %vm402_vm2, %v377_v7  ;;  %1947 = vmatmul.msk.bf16.gmra.mxu3 %vm402_vm2, %v401_v14  ;;  %v921_v2 = vor.u32 %v920_v1, %v917_v63  ;;  %v924_v7 = vshrl.u32 %v2427_v5, 16  ;;  %v574_v14 = vsel %vm569_vm4, %v571_v57, %v573_v4  ;;  %v951_v51 = vshrl.u32 %v2472_v49, 16 }
  0x30   : > { %v766_v15 = vsel %vm569_vm4, %v763_v58, %v765_v6  ;;  %v768_v26 = vsel %vm569_vm4, %v765_v6, %v767_v22  ;;  %v578_v41 = vsel %vm569_vm4, %v575_v20, %v577_v32  ;;  %v770_v42 = vsel %vm569_vm4, %v767_v22, %v769_v34 }
  0x31   : > { %v922_v3 = vsel %vm887_vm3, %v912_v53, %v921_v2  ;;  %v926_v16 = vrot.slane %v924_v7, 1  ;;  %v953_v54 = vrot.slane %v951_v51, 1  ;;  %v581_v58 = vrot.slane %v2335_v39, 1 }
  0x32   : > { %v773_v60 = vrot.slane %v2472_v49, 1 }
  0x33   : > { %2010 = vmatmul.msk.bf16.vlgmr.msrb.gmra.mxu0 %vm402_vm2, %v904_v33  ;;  %v2457_v33 = vld [vmem:[%s2287_s7 + $0x38] sm:$0xff] }
  0x34   : > { %v942_v36 = vshrl.u32 %v2457_v33, 16  ;;  %v771_v50 = vrot.slane %v2457_v33, 1 }
  0x36   : > { %v944_v43 = vrot.slane %v942_v36, 1  ;;  %v772_v53 = vsel %vm569_vm4, %v769_v34, %v771_v50  ;;  %v774_v1 = vsel %vm569_vm4, %v771_v50, %v773_v60 }
  0x3e   : > { %1942 = vmatmul.msk.bf16.gmra.mxu1 %vm402_vm2, %v361_v46 }
  0x3f   : > { %1945 = vmatmul.msk.bf16.gmra.mxu2 %vm402_vm2, %v385_v47  ;;  %2000 = vmatmul.msk.bf16.vlgmr.msrb.gmra.mxu3 %vm402_vm2, %v762_v48  ;;  %v579_v48 = vrot.slane %v2299_v11, 1 }
  0x41   : > { %v580_v52 = vsel %vm569_vm4, %v577_v32, %v579_v48  ;;  %v582_v63 = vsel %vm569_vm4, %v579_v48, %v581_v58  ;;  %v709_v32 = vld [vmem:[%s2287_s7 + $0x50] sm:$0x1]  ;;  %v585_v48 = vrot.slane %v2305_v13, 1 }
  0x42   : > { %v749_v34 = vunpack.c.l.b16 %v709_v32 }
  0x43   : > { %2011 = vmatmul.msk.bf16.gmra.mxu0 %vm402_vm2, %v913_v24 }
  0x4e   : > { %1948 = vmatmul.msk.bf16.vlgmr.msrb.gmra.mxu1 %vm402_vm2, %v2329_v37  ;;  %v927_v37 = vshll.u32 %v2427_v5, 16 }
  0x4f   : > { %1958 = vmatmul.msk.bf16.vlgmr.msrb.gmra.mxu2 %vm402_vm2, %v572_v61  ;;  %2001 = vmatmul.msk.bf16.gmra.mxu3 %vm402_vm2, %v764_v62  ;;  %v960_v61 = vshrl.u32 %v2487_v59, 16 }
  0x50   : > { %v929_v17 = vrot.slane %v927_v37, 2 }
  0x52   : > { %v930_v18 = vor.u32 %v929_v17, %v926_v16  ;;  %v881_v16 = vld [vmem:[%s2287_s7 + $0x50] sm:$0x3] }
  0x53   : > { %2012 = vmatmul.msk.bf16.gmra.mxu0 %vm402_vm2, %v922_v3  ;;  %v885_v17 = vunpack.c.l.b16 %v881_v16 }
  0x54   : > { %v931_v19 = vsel %vm887_vm3, %v921_v2, %v930_v18  ;;  %v962_v2 = vrot.slane %v960_v61, 1 }
  0x5e   : > { %1949 = vmatmul.msk.bf16.gmra.mxu1 %vm402_vm2, %v2290_v8  ;;  %v936_v8 = vshll.u32 %v2442_v21, 16 }
  0x5f   : > { %1959 = vmatmul.msk.bf16.gmra.mxu2 %vm402_vm2, %v574_v14  ;;  %2002 = vmatmul.msk.bf16.gmra.mxu3 %vm402_vm2, %v766_v15 }
  0x60   : > { %v938_v29 = vrot.slane %v936_v8, 2 }
  0x62   : > { %v939_v30 = vor.u32 %v938_v29, %v935_v28 }
  0x63   : > { %2013 = vmatmul.msk.bf16.gmra.mxu0 %vm402_vm2, %v931_v19  ;;  %v775_v19 = vrot.slane %v2487_v59, 1 }
  0x64   : > { %v940_v31 = vsel %vm887_vm3, %v930_v18, %v939_v30  ;;  %v2512_v18 = vpack.c.b16 %v885_v17, %v885_v17 }
  0x65   : > { %v776_v28 = vsel %vm569_vm4, %v773_v60, %v775_v19 }
  0x66   : > { %v969_v22 = vshrl.u32 %v2512_v18, 16  ;;  %v972_v23 = vshll.u32 %v2512_v18, 16 }
  0x6e   : > { %1950 = vmatmul.msk.bf16.gmra.mxu1 %vm402_vm2, %v2293_v9  ;;  %v945_v9 = vshll.u32 %v2457_v33, 16 }
  0x6f   : > { %1960 = vmatmul.msk.bf16.gmra.mxu2 %vm402_vm2, %v576_v25  ;;  %2003 = vmatmul.msk.bf16.gmra.mxu3 %vm402_vm2, %v768_v26 }
  0x70   : > { %v947_v44 = vrot.slane %v945_v9, 2 }
  0x72   : > { %v948_v46 = vor.u32 %v947_v44, %v944_v43  ;;  %v759_v43 = vpack.c.b16 %v749_v34, %v749_v34 }
  0x73   : > { %2014 = vmatmul.msk.bf16.gmra.mxu0 %vm402_vm2, %v940_v31  ;;  %v974_v31 = vrot.slane %v972_v23, 2 }
  0x74   : > { %v949_v47 = vsel %vm887_vm3, %v939_v30, %v948_v46  ;;  %v971_v30 = vrot.slane %v969_v22, 1 }
  0x76   : > { %v975_v36 = vor.u32 %v974_v31, %v971_v30  ;;  %v587_v31 = vrot.slane %v2338_v40, 1 }
  0x7e   : > { %1951 = vmatmul.msk.bf16.gmra.mxu1 %vm402_vm2, %v2326_v35  ;;  %v954_v35 = vshll.u32 %v2472_v49, 16 }
  0x7f   : > { %1961 = vmatmul.msk.bf16.gmra.mxu2 %vm402_vm2, %v578_v41  ;;  %2004 = vmatmul.msk.bf16.gmra.mxu3 %vm402_vm2, %v770_v42 }
  0x80   : > { %v956_v24 = vrot.slane %v954_v35, 2  ;;  %v777_v35 = vrot.slane %v759_v43, 1 }
  0x82   : > { %v957_v56 = vor.u32 %v956_v24, %v953_v54  ;;  %v778_v60 = vsel %vm569_vm4, %v775_v19, %v777_v35  ;;  %v1079_v35 = vld [vmem:[%s2287_s7 + $0x8] sm:$0xc] }
  0x83   : > { %2015 = vmatmul.msk.bf16.gmra.mxu0 %vm402_vm2, %v949_v47  ;;  %v1207_v47 = vld [vmem:[%s2287_s7 + $0x10] sm:$0xc]  ;;  %v1083_v40 = vunpack.c.l.b16 %v1079_v35 }
  0x84   : > { %v958_v57 = vsel %vm887_vm3, %v948_v46, %v957_v56  ;;  %v1247_v50 = vunpack.c.l.b16 %v1207_v47  ;;  %v588_v47 = vsel %vm569_vm4, %v585_v48, %v587_v31 }
  0x8e   : > { %1952 = vmatmul.msk.bf16.gmra.mxu1 %vm402_vm2, %v2296_v10  ;;  %v963_v10 = vshll.u32 %v2487_v59, 16 }
  0x8f   : > { %1962 = vmatmul.msk.bf16.gmra.mxu2 %vm402_vm2, %v580_v52  ;;  %2005 = vmatmul.msk.bf16.gmra.mxu3 %vm402_vm2, %v772_v53  ;;  %v1595_v52 = vld [vmem:[%s2287_s7 + $0x10] sm:$0x8] }
  0x90   : > { %v965_v3 = vrot.slane %v963_v10, 2  ;;  %v1599_v54 = vunpack.c.l.b16 %v1595_v52  ;;  %v2559_v10 = vld [vmem:[%s2287_s7 + $0x18] sm:$0xff] }
  0x91   : > { %v1603_v16 = vrot.slane %v2559_v10, 3  ;;  %v1277_v45 = vrot.slane %v2559_v10, 2 }
  0x92   : > { %v966_v4 = vor.u32 %v965_v3, %v962_v2  ;;  %v1413_v3 = vshrl.u32 %v2559_v10, 16 }
  0x93   : > { %2016 = vmatmul.msk.bf16.gmra.mxu0 %vm402_vm2, %v958_v57 }
  0x94   : > { %v967_v15 = vsel %vm887_vm3, %v957_v56, %v966_v4  ;;  %v976_v46 = vsel %vm887_vm3, %v966_v4, %v975_v36  ;;  %v1416_v4 = vshll.u32 %v2559_v10, 16  ;;  %v1415_v23 = vrot.slane %v1413_v3, 2 }
  0x9b   : > { %v2492_v62 = vpop.f32.mrf.mxu1 }
  0x9e   : > { %1953 = vmatmul.msk.bf16.gmra.mxu1 %vm402_vm2, %v2299_v11  ;;  %v583_v11 = vrot.slane %v2302_v12, 1 }
  0x9f   : > { %1963 = vmatmul.msk.bf16.gmra.mxu2 %vm402_vm2, %v582_v63  ;;  %2006 = vmatmul.msk.bf16.gmra.mxu3 %vm402_vm2, %v774_v1 }
  0xa0   : > { %v2506_v14 = vpop.f32.mrf.mxu0  ;;  %v584_v26 = vsel %vm569_vm4, %v581_v58, %v583_v11  ;;  %v586_v57 = vsel %vm569_vm4, %v583_v11, %v585_v48 }
  0xa2   : > { %v2500_v6 = vpop.f32.mrf.mxu2  ;;  %v2502_v7 = vpop.f32.mrf.mxu3 }
  0xa3   : > { %v2504_v37 = vpop.f32.mrf.mxu1  ;;  %2017 = vmatmul.msk.bf16.gmra.mxu0 %vm402_vm2, %v967_v15 }
  0xa8   : > { %v2525_v29 = vpop.f32.mrf.mxu0 }
  0xaa   : > { %v2515_v20 = vpop.f32.mrf.mxu2  ;;  %v2519_v8 = vpop.f32.mrf.mxu3 }
  0xab   : > { %v2521_v25 = vpop.f32.mrf.mxu1 }
  0xae   : > { %1954 = vmatmul.msk.bf16.gmra.mxu1 %vm402_vm2, %v2335_v39  ;;  %v1208_v39 = vld [vmem:[%s2287_s7 + $0x14] sm:$0xf] }
  0xaf   : > { %1964 = vmatmul.msk.bf16.gmra.mxu2 %vm402_vm2, %v584_v26  ;;  %2007 = vmatmul.msk.bf16.gmra.mxu3 %vm402_vm2, %v776_v28  ;;  %v1248_v51 = vunpack.c.l.b16 %v1208_v39  ;;  %v1418_v26 = vrot.slane %v1416_v4, 3  ;;  %v2583_v39 = vld [vmem:[%s2287_s7 + $0x20] sm:$0xff] }
  0xb0   : > { %v2538_v44 = vpop.f32.mrf.mxu0  ;;  %v1425_v48 = vshll.u32 %v2583_v39, 16 }
  0xb1   : > { %v2553_v58 = vpack.c.b16 %v1248_v51, %v1247_v50  ;;  %v1600_v63 = vpack.c.b16 %v1248_v51, %v1599_v54  ;;  %v1419_v34 = vor.u32 %v1418_v26, %v1415_v23  ;;  %v1422_v54 = vshrl.u32 %v2583_v39, 16 }
  0xb2   : > { %v2532_v9 = vpop.f32.mrf.mxu2  ;;  %v2534_v41 = vpop.f32.mrf.mxu3 }
  0xb3   : > { %v2536_v42 = vpop.f32.mrf.mxu1  ;;  %2018 = vmatmul.msk.bf16.gmra.mxu0 %vm402_vm2, %v976_v46  ;;  %v1405_v1 = vshrl.u32 %v2553_v58, 16  ;;  %v1408_v2 = vshll.u32 %v2553_v58, 16  ;;  %v1602_v15 = vrot.slane %v1600_v63, 3  ;;  %v1424_v3 = vrot.slane %v1422_v54, 2 }
  0xb4   : > { %v1276_v31 = vrot.slane %v2553_v58, 2 }
  0xb5   : > { %v1407_v19 = vrot.slane %v1405_v1, 2  ;;  %v1410_v22 = vrot.slane %v1408_v2, 3  ;;  %v1604_v30 = vsel %vm1601_vm5, %v1602_v15, %v1603_v16  ;;  %v1084_v2 = vpack.c.b16 %v732_v55, %v1083_v40 }
  0xb6   : > { %v1427_v15 = vrot.slane %v1425_v48, 3 }
  0xb7   : > { %v1411_v32 = vor.u32 %v1410_v22, %v1407_v19  ;;  %v1086_v26 = vrot.slane %v1084_v2, 2 }
  0xb8   : > { %v2556_v61 = vpop.f32.mrf.mxu0  ;;  %v1428_v55 = vor.u32 %v1427_v15, %v1424_v3  ;;  %v1279_v15 = vrot.slane %v2583_v39, 2 }
  0xb9   : > { %v1420_v51 = vsel %vm1403_vm6, %v1411_v32, %v1419_v34 }
  0xba   : > { %v2546_v53 = vpop.f32.mrf.mxu2  ;;  %v2548_v24 = vpop.f32.mrf.mxu3  ;;  %v1429_v58 = vsel %vm1403_vm6, %v1419_v34, %v1428_v55 }
  0xbb   : > { %v2550_v56 = vpop.f32.mrf.mxu1 }
  0xbe   : > { %1955 = vmatmul.msk.bf16.gmra.mxu1 %vm402_vm2, %v2302_v12 }
  0xbf   : > { %1965 = vmatmul.msk.bf16.gmra.mxu2 %vm402_vm2, %v586_v57  ;;  %2008 = vmatmul.msk.bf16.gmra.mxu3 %vm402_vm2, %v778_v60  ;;  %v1605_v57 = vrot.slane %v2583_v39, 3 }
  0xc0   : > { %v2574_v28 = vpop.f32.mrf.mxu0 }
  0xc1   : > { %v1606_v22 = vsel %vm1601_vm5, %v1603_v16, %v1605_v57 }
  0xc2   : > { %v2570_v17 = vpop.f32.mrf.mxu2  ;;  %v818_v11 = vpop.f32.mrf.mxu3 }
  0xc3   : > { %v2572_v12 = vpop.f32.mrf.mxu1  ;;  %2082 = vmatmul.msk.bf16.vlgmr.msra.gmra.mxu0 %vm402_vm2, %v1604_v30  ;;  %v1087_v30 = vrot.slane %v2360_v0, 2 }
  0xc5   : > { %v1088_v16 = vsel %vm1085_vm7, %v1086_v26, %v1087_v30 }
  0xc8   : > { %v2588_v52 = vpop.f32.mrf.mxu0 }
  0xca   : > { %v2579_v36 = vpop.f32.mrf.mxu2  ;;  %v820_v43 = vpop.f32.mrf.mxu3 }
  0xcb   : > { %v518_v46 = vpop.f32.mrf.mxu1 }
  0xcc   : > { %v519_v50 = vadd.f32 %v518_v46, %v2506_v14 }
  0xce   : > { %1956 = vmatmul.msk.bf16.gmra.mxu1 %vm402_vm2, %v2305_v13 }
  0xcf   : > { %1966 = vmatmul.msk.bf16.gmra.mxu2 %vm402_vm2, %v588_v47  ;;  %2072 = vmatmul.msk.bf16.vlgmr.msra.gmra.mxu3 %vm402_vm2, %v1420_v51  ;;  %v2613_v47 = vld [vmem:[%s2287_s7 + $0x28] sm:$0xff] }
  0xd0   : > { %v2600_v19 = vpop.f32.mrf.mxu0  ;;  %v1431_v35 = vshrl.u32 %v2613_v47, 16  ;;  %v1434_v40 = vshll.u32 %v2613_v47, 16 }
  0xd2   : > { %v628_v14 = vpop.f32.mrf.mxu2  ;;  %v823_v63 = vpop.f32.mrf.mxu3  ;;  %v1436_v2 = vrot.slane %v1434_v40, 3 }
  0xd3   : > { %v673_v60 = vadd.f32 %v628_v14, %v519_v50  ;;  %v520_v1 = vpop.f32.mrf.mxu1  ;;  %2083 = vmatmul.msk.bf16.gmra.mxu0 %vm402_vm2, %v1606_v22  ;;  %v1433_v14 = vrot.slane %v1431_v35, 2 }
  0xd4   : > { %v521_v4 = vadd.f32 %v520_v1, %v2525_v29 }
  0xd5   : > { %v863_v13 = vadd.f32 %v818_v11, %v673_v60  ;;  %v1437_v22 = vor.u32 %v1436_v2, %v1433_v14  ;;  %v1281_v14 = vrot.slane %v2613_v47, 2 }
  0xd7   : > { %v2604_v23 = vadd.f32 %v2538_v44, %v863_v13  ;;  %v1278_v44 = vsel %vm1085_vm7, %v1276_v31, %v1277_v45 }
  0xd8   : > { %v2617_v10 = vpop.f32.mrf.mxu0 }
  0xda   : > { %v630_v29 = vpop.f32.mrf.mxu2  ;;  %v825_v32 = vpop.f32.mrf.mxu3 }
  0xdb   : > { %v674_v11 = vadd.f32 %v630_v29, %v521_v4  ;;  %v523_v46 = vpop.f32.mrf.mxu1  ;;  %v1089_v4 = vrot.slane %v2393_v38, 2  ;;  %v1438_v38 = vsel %vm1403_vm6, %v1428_v55, %v1437_v22 }
  0xdc   : > { %v524_v0 = vadd.f32 %v523_v46, %v2492_v62  ;;  %v2641_v46 = vld [vmem:[%s2287_s7 + $0x30] sm:$0xff] }
  0xdd   : > { %v864_v50 = vadd.f32 %v820_v43, %v674_v11  ;;  %v1607_v43 = vrot.slane %v2613_v47, 3  ;;  %v1280_v11 = vsel %vm1085_vm7, %v1277_v45, %v1279_v15  ;;  %v1443_v45 = vshll.u32 %v2641_v46, 16 }
  0xde   : > { %2020 = vmatmul.msk.bf16.vlgmr.msra.gmra.mxu1 %vm402_vm2, %v1088_v16 }
  0xdf   : > { %2062 = vmatmul.msk.bf16.vlgmr.msra.gmra.mxu2 %vm402_vm2, %v1278_v44  ;;  %v2622_v51 = vadd.f32 %v2556_v61, %v864_v50  ;;  %2073 = vmatmul.msk.bf16.gmra.mxu3 %vm402_vm2, %v1429_v58  ;;  %v1608_v3 = vsel %vm1601_vm5, %v1605_v57, %v1607_v43  ;;  %v1445_v40 = vrot.slane %v1443_v45, 3 }
  0xe0   : > { %v2629_v61 = vpop.f32.mrf.mxu0 }
  0xe2   : > { %v633_v62 = vpop.f32.mrf.mxu2  ;;  %v828_v34 = vpop.f32.mrf.mxu3 }
  0xe3   : > { %v675_v54 = vadd.f32 %v633_v62, %v524_v0  ;;  %v525_v48 = vpop.f32.mrf.mxu1  ;;  %2084 = vmatmul.msk.bf16.gmra.mxu0 %vm402_vm2, %v1608_v3 }
  0xe4   : > { %v526_v1 = vadd.f32 %v525_v48, %v2504_v37  ;;  %v1090_v37 = vsel %vm1085_vm7, %v1087_v30, %v1089_v4  ;;  %v1440_v30 = vshrl.u32 %v2641_v46, 16  ;;  %v1091_v48 = vrot.slane %v2412_v27, 2 }
  0xe5   : > { %v865_v60 = vadd.f32 %v823_v63, %v675_v54 }
  0xe6   : > { %v1442_v0 = vrot.slane %v1440_v30, 2 }
  0xe7   : > { %v2633_v13 = vadd.f32 %v2574_v28, %v865_v60 }
  0xe8   : > { %v2645_v16 = vpop.f32.mrf.mxu0  ;;  %v1446_v60 = vor.u32 %v1445_v40, %v1442_v0 }
  0xea   : > { %v635_v26 = vpop.f32.mrf.mxu2  ;;  %v830_v31 = vpop.f32.mrf.mxu3  ;;  %v1447_v27 = vsel %vm1403_vm6, %v1437_v22, %v1446_v60 }
  0xeb   : > { %v676_v63 = vadd.f32 %v635_v26, %v526_v1  ;;  %v528_v29 = vpop.f32.mrf.mxu1  ;;  %v1282_v26 = vsel %vm1085_vm7, %v1279_v15, %v1281_v14 }
  0xec   : > { %v529_v28 = vadd.f32 %v528_v29, %v2521_v25 }
  0xed   : > { %v866_v57 = vadd.f32 %v825_v32, %v676_v63  ;;  %v1609_v32 = vrot.slane %v2641_v46, 3  ;;  %v2669_v63 = vld [vmem:[%s2287_s7 + $0x38] sm:$0xff] }
  0xee   : > { %2021 = vmatmul.msk.bf16.gmra.mxu1 %vm402_vm2, %v1090_v37  ;;  %v1452_v15 = vshll.u32 %v2669_v63, 16 }
  0xef   : > { %2063 = vmatmul.msk.bf16.gmra.mxu2 %vm402_vm2, %v1280_v11  ;;  %v2650_v39 = vadd.f32 %v2588_v52, %v866_v57  ;;  %2074 = vmatmul.msk.bf16.gmra.mxu3 %vm402_vm2, %v1438_v38  ;;  %v1610_v62 = vsel %vm1601_vm5, %v1607_v43, %v1609_v32 }
  0xf0   : > { %v2657_v52 = vpop.f32.mrf.mxu0  ;;  %v1454_v30 = vrot.slane %v1452_v15, 3  ;;  %v1095_v15 = vrot.slane %v2442_v21, 2  ;;  %v2728_v21 = vld [vmem:[%s2287_s7 + $0x48] sm:$0xff] }
  0xf2   : > { %v638_v25 = vpop.f32.mrf.mxu2  ;;  %v833_v55 = vpop.f32.mrf.mxu3 }
  0xf3   : > { %v677_v44 = vadd.f32 %v638_v25, %v529_v28  ;;  %v530_v50 = vpop.f32.mrf.mxu1  ;;  %2085 = vmatmul.msk.bf16.gmra.mxu0 %vm402_vm2, %v1610_v62 }
  0xf4   : > { %v531_v35 = vadd.f32 %v530_v50, %v2536_v42  ;;  %v1092_v42 = vsel %vm1085_vm7, %v1089_v4, %v1091_v48  ;;  %v1449_v4 = vshrl.u32 %v2669_v63, 16  ;;  %v1283_v50 = vrot.slane %v2641_v46, 2 }
  0xf5   : > { %v867_v58 = vadd.f32 %v828_v34, %v677_v44  ;;  %v1093_v44 = vrot.slane %v2427_v5, 2 }
  0xf6   : > { %v1451_v57 = vrot.slane %v1449_v4, 2  ;;  %v1284_v62 = vsel %vm1085_vm7, %v1281_v14, %v1283_v50 }
  0xf7   : > { %v2661_v54 = vadd.f32 %v2600_v19, %v867_v58  ;;  %v1094_v40 = vsel %vm1085_vm7, %v1091_v48, %v1093_v44 }
  0xf8   : > { %v2673_v29 = vpop.f32.mrf.mxu0  ;;  %v1455_v0 = vor.u32 %v1454_v30, %v1451_v57  ;;  %v1096_v30 = vsel %vm1085_vm7, %v1093_v44, %v1095_v15  ;;  %v1467_v44 = vshrl.u32 %v2728_v21, 16 }
  0xfa   : > { %v640_v1 = vpop.f32.mrf.mxu2  ;;  %v835_v2 = vpop.f32.mrf.mxu3 }
  0xfb   : > { %v678_v34 = vadd.f32 %v640_v1, %v531_v35  ;;  %v533_v3 = vpop.f32.mrf.mxu1 }
  0xfc   : > { %v534_v19 = vadd.f32 %v533_v3, %v2550_v56 }
  0xfd   : > { %v868_v43 = vadd.f32 %v830_v31, %v678_v34  ;;  %v1611_v31 = vrot.slane %v2669_v63, 3  ;;  %v2700_v34 = vld [vmem:[%s2287_s7 + $0x40] sm:$0xff] }
  0xfe   : > { %2022 = vmatmul.msk.bf16.gmra.mxu1 %vm402_vm2, %v1092_v42  ;;  %v1458_v48 = vshrl.u32 %v2700_v34, 16  ;;  %v1461_v14 = vshll.u32 %v2700_v34, 16 }
  0xff   : > { %2064 = vmatmul.msk.bf16.gmra.mxu2 %vm402_vm2, %v1282_v26  ;;  %v2678_v47 = vadd.f32 %v2617_v10, %v868_v43  ;;  %2075 = vmatmul.msk.bf16.gmra.mxu3 %vm402_vm2, %v1447_v27  ;;  %v1612_v10 = vsel %vm1601_vm5, %v1609_v32, %v1611_v31  ;;  %v1456_v32 = vsel %vm1403_vm6, %v1446_v60, %v1455_v0  ;;  %v1613_v60 = vrot.slane %v2700_v34, 3 }
 0x100   : > { %v2685_v45 = vpop.f32.mrf.mxu0  ;;  %v1463_v27 = vrot.slane %v1461_v14, 3  ;;  %v1287_v14 = vrot.slane %v2700_v34, 2 }
 0x102   : > { %v643_v56 = vpop.f32.mrf.mxu2  ;;  %v838_v22 = vpop.f32.mrf.mxu3 }
 0x103   : > { %v679_v37 = vadd.f32 %v643_v56, %v534_v19  ;;  %v535_v11 = vpop.f32.mrf.mxu1  ;;  %2086 = vmatmul.msk.bf16.gmra.mxu0 %vm402_vm2, %v1612_v10  ;;  %v1460_v19 = vrot.slane %v1458_v48, 2  ;;  %v1285_v56 = vrot.slane %v2669_v63, 2  ;;  %v1097_v48 = vrot.slane %v2457_v33, 2  ;;  %v2756_v33 = vld [vmem:[%s2287_s7 + $0x50] sm:$0xff] }
 0x104   : > { %v536_v38 = vadd.f32 %v535_v11, %v2572_v12 }
 0x105   : > { %v869_v28 = vadd.f32 %v833_v55, %v679_v37  ;;  %v1464_v11 = vor.u32 %v1463_v27, %v1460_v19  ;;  %v1098_v27 = vsel %vm1085_vm7, %v1095_v15, %v1097_v48  ;;  %v1476_v15 = vshrl.u32 %v2756_v33, 16 }
 0x107   : > { %v2689_v25 = vadd.f32 %v2629_v61, %v869_v28 }
 0x108   : > { %v2697_v61 = vpop.f32.mrf.mxu0 }
 0x10a   : > { %v645_v58 = vpop.f32.mrf.mxu2  ;;  %v840_v35 = vpop.f32.mrf.mxu3 }
 0x10b   : > { %v680_v55 = vadd.f32 %v645_v58, %v536_v38  ;;  %v538_v12 = vpop.f32.mrf.mxu1 }
 0x10c   : > { %v539_v46 = vadd.f32 %v538_v12, %v2500_v6 }
 0x10d   : > { %v870_v1 = vadd.f32 %v835_v2, %v680_v55 }
 0x10e   : > { %2023 = vmatmul.msk.bf16.gmra.mxu1 %vm402_vm2, %v1094_v40 }
 0x10f   : > { %2065 = vmatmul.msk.bf16.gmra.mxu2 %vm402_vm2, %v1284_v62  ;;  %v2705_v5 = vadd.f32 %v2645_v16, %v870_v1  ;;  %2076 = vmatmul.msk.bf16.gmra.mxu3 %vm402_vm2, %v1456_v32  ;;  %v1614_v16 = vsel %vm1601_vm5, %v1611_v31, %v1613_v60  ;;  %v1286_v31 = vsel %vm1085_vm7, %v1283_v50, %v1285_v56  ;;  %v1470_v50 = vshll.u32 %v2728_v21, 16 }
 0x110   : > { %v2712_v4 = vpop.f32.mrf.mxu0  ;;  %v1469_v1 = vrot.slane %v1467_v44, 2  ;;  %v1099_v44 = vrot.slane %v2472_v49, 2 }
 0x111   : > { %v1472_v32 = vrot.slane %v1470_v50, 3  ;;  %v1289_v50 = vrot.slane %v2728_v21, 2 }
 0x112   : > { %v648_v2 = vpop.f32.mrf.mxu2  ;;  %v843_v42 = vpop.f32.mrf.mxu3 }
 0x113   : > { %v681_v3 = vadd.f32 %v648_v2, %v539_v46  ;;  %v540_v26 = vpop.f32.mrf.mxu1  ;;  %2087 = vmatmul.msk.bf16.gmra.mxu0 %vm402_vm2, %v1614_v16 }
 0x114   : > { %v541_v37 = vadd.f32 %v540_v26, %v2515_v20 }
 0x115   : > { %v871_v43 = vadd.f32 %v838_v22, %v681_v3  ;;  %v1473_v3 = vor.u32 %v1472_v32, %v1469_v1 }
 0x117   : > { %v2716_v6 = vadd.f32 %v2657_v52, %v871_v43  ;;  %v1465_v52 = vsel %vm1403_vm6, %v1455_v0, %v1464_v11  ;;  %v1615_v0 = vrot.slane %v2728_v21, 3 }
 0x118   : > { %v2725_v58 = vpop.f32.mrf.mxu0 }
 0x11a   : > { %v650_v22 = vpop.f32.mrf.mxu2  ;;  %v845_v28 = vpop.f32.mrf.mxu3 }
 0x11b   : > { %v682_v57 = vadd.f32 %v650_v22, %v541_v37  ;;  %v543_v38 = vpop.f32.mrf.mxu1 }
 0x11c   : > { %v544_v63 = vadd.f32 %v543_v38, %v2532_v9 }
 0x11d   : > { %v872_v10 = vadd.f32 %v840_v35, %v682_v57 }
 0x11e   : > { %2024 = vmatmul.msk.bf16.gmra.mxu1 %vm402_vm2, %v1096_v30 }
 0x11f   : > { %2066 = vmatmul.msk.bf16.gmra.mxu2 %vm402_vm2, %v1286_v31  ;;  %v2733_v20 = vadd.f32 %v2673_v29, %v872_v10  ;;  %2077 = vmatmul.msk.bf16.gmra.mxu3 %vm402_vm2, %v1465_v52  ;;  %v1616_v29 = vsel %vm1601_vm5, %v1613_v60, %v1615_v0  ;;  %v1288_v60 = vsel %vm1085_vm7, %v1285_v56, %v1287_v14  ;;  %v1479_v56 = vshll.u32 %v2756_v33, 16 }
 0x120   : > { %v2740_v46 = vpop.f32.mrf.mxu0  ;;  %v1478_v31 = vrot.slane %v1476_v15, 2 }
 0x121   : > { %v1481_v10 = vrot.slane %v1479_v56, 3  ;;  %v1101_v56 = vrot.slane %v2487_v59, 2  ;;  %v1225_v59 = vld [vmem:[%s2287_s7 + $0x58] sm:$0x3] }
 0x122   : > { %v653_v55 = vpop.f32.mrf.mxu2  ;;  %v848_v12 = vpop.f32.mrf.mxu3 }
 0x123   : > { %v683_v35 = vadd.f32 %v653_v55, %v544_v63  ;;  %v545_v40 = vpop.f32.mrf.mxu1  ;;  %2088 = vmatmul.msk.bf16.gmra.mxu0 %vm402_vm2, %v1616_v29  ;;  %v1397_v63 = vld [vmem:[%s2287_s7 + $0x58] sm:$0x7]  ;;  %v1290_v29 = vsel %vm1085_vm7, %v1287_v14, %v1289_v50 }
 0x124   : > { %v546_v2 = vadd.f32 %v545_v40, %v2546_v53 }
 0x125   : > { %v873_v62 = vadd.f32 %v843_v42, %v683_v35  ;;  %v1482_v35 = vor.u32 %v1481_v10, %v1478_v31  ;;  %v1102_v10 = vsel %vm1085_vm7, %v1099_v44, %v1101_v56 }
 0x127   : > { %v2744_v9 = vadd.f32 %v2685_v45, %v873_v62  ;;  %v1474_v45 = vsel %vm1403_vm6, %v1464_v11, %v1473_v3  ;;  %v1617_v11 = vrot.slane %v2756_v33, 3 }
 0x128   : > { %v2753_v37 = vpop.f32.mrf.mxu0 }
 0x12a   : > { %v655_v42 = vpop.f32.mrf.mxu2  ;;  %v850_v43 = vpop.f32.mrf.mxu3 }
 0x12b   : > { %v684_v26 = vadd.f32 %v655_v42, %v546_v2  ;;  %v548_v19 = vpop.f32.mrf.mxu1  ;;  %v1483_v2 = vsel %vm1403_vm6, %v1473_v3, %v1482_v35 }
 0x12c   : > { %v549_v34 = vadd.f32 %v548_v19, %v2570_v17 }
 0x12d   : > { %v874_v16 = vadd.f32 %v845_v28, %v684_v26 }
 0x12e   : > { %2025 = vmatmul.msk.bf16.gmra.mxu1 %vm402_vm2, %v1098_v27 }
 0x12f   : > { %2067 = vmatmul.msk.bf16.gmra.mxu2 %vm402_vm2, %v1288_v60  ;;  %v2761_v53 = vadd.f32 %v2697_v61, %v874_v16  ;;  %2078 = vmatmul.msk.bf16.gmra.mxu3 %vm402_vm2, %v1474_v45  ;;  %v1618_v61 = vsel %vm1601_vm5, %v1615_v0, %v1617_v11  ;;  %v1100_v0 = vsel %vm1085_vm7, %v1097_v48, %v1099_v44 }
 0x130   : > { %v2768_v52 = vpop.f32.mrf.mxu0 }
 0x132   : > { %v658_v22 = vpop.f32.mrf.mxu2  ;;  %v853_v28 = vpop.f32.mrf.mxu3 }
 0x133   : > { %v685_v57 = vadd.f32 %v658_v22, %v549_v34  ;;  %v550_v38 = vpop.f32.mrf.mxu1  ;;  %2089 = vmatmul.msk.bf16.gmra.mxu0 %vm402_vm2, %v1618_v61 }
 0x134   : > { %v551_v55 = vadd.f32 %v550_v38, %v2579_v36 }
 0x135   : > { %v875_v30 = vadd.f32 %v848_v12, %v685_v57  ;;  %v1401_v12 = vunpack.c.l.b16 %v1397_v63 }
 0x137   : > { %v2773_v17 = vadd.f32 %v2712_v4, %v875_v30  ;;  %v1402_v21 = vpack.c.b16 %v1401_v12, %v1401_v12 }
 0x138   : > { %v2782_v49 = vpop.f32.mrf.mxu0 }
 0x139   : > { %v1485_v48 = vshrl.u32 %v1402_v21, 16  ;;  %v1488_v26 = vshll.u32 %v1402_v21, 16  ;;  %v1619_v14 = vrot.slane %v1402_v21, 3 }
 0x13a   : > { %v660_v40 = vpop.f32.mrf.mxu2  ;;  %v855_v1 = vpop.f32.mrf.mxu3 }
 0x13b   : > { %v686_v62 = vadd.f32 %v660_v40, %v551_v55  ;;  %v553_v32 = vpop.f32.mrf.mxu1  ;;  %v1487_v16 = vrot.slane %v1485_v48, 2  ;;  %v1490_v45 = vrot.slane %v1488_v26, 3  ;;  %v1620_v15 = vsel %vm1601_vm5, %v1617_v11, %v1619_v14 }
 0x13c   : > { %v554_v42 = vadd.f32 %v553_v32, %v2502_v7  ;;  %v1291_v7 = vrot.slane %v2756_v33, 2  ;;  %v1265_v33 = vunpack.c.l.b16 %v1225_v59  ;;  %v1103_v32 = vrot.slane %v2512_v18, 2 }
 0x13d   : > { %v876_v4 = vadd.f32 %v850_v43, %v686_v62  ;;  %v1491_v57 = vor.u32 %v1490_v45, %v1487_v16 }
 0x13e   : > { %2026 = vmatmul.msk.bf16.gmra.mxu1 %vm402_vm2, %v1100_v0  ;;  %v1292_v11 = vsel %vm1085_vm7, %v1289_v50, %v1291_v7  ;;  %v1275_v62 = vpack.c.b16 %v1265_v33, %v1265_v33 }
 0x13f   : > { %2068 = vmatmul.msk.bf16.gmra.mxu2 %vm402_vm2, %v1290_v29  ;;  %v2787_v36 = vadd.f32 %v2725_v58, %v876_v4  ;;  %2079 = vmatmul.msk.bf16.gmra.mxu3 %vm402_vm2, %v1483_v2 }
 0x140   : > { %v1660_v34 = vpop.f32.mrf.mxu0 }
 0x142   : > { %v663_v43 = vpop.f32.mrf.mxu2  ;;  %v858_v3 = vpop.f32.mrf.mxu3 }
 0x143   : > { %v687_v19 = vadd.f32 %v663_v43, %v554_v42  ;;  %v555_v27 = vpop.f32.mrf.mxu1  ;;  %2090 = vmatmul.msk.bf16.gmra.mxu0 %vm402_vm2, %v1620_v15  ;;  %v1104_v42 = vsel %vm1085_vm7, %v1101_v56, %v1103_v32 }
 0x144   : > { %v556_v22 = vadd.f32 %v555_v27, %v2519_v8 }
 0x145   : > { %v877_v60 = vadd.f32 %v853_v28, %v687_v19 }
 0x147   : > { %v2793_v58 = vadd.f32 %v2740_v46, %v877_v60  ;;  %v1492_v46 = vsel %vm1403_vm6, %v1482_v35, %v1491_v57  ;;  %v2828_v60 = vld [vmem:[%s2923_s2] ss:$0 sm:$0xff] }
 0x148   : > { %v1662_v63 = vpop.f32.mrf.mxu0 }
 0x14a   : > { %v665_v38 = vpop.f32.mrf.mxu2  ;;  %v860_v30 = vpop.f32.mrf.mxu3 }
 0x14b   : > { %v688_v28 = vadd.f32 %v665_v38, %v556_v22  ;;  %v558_v31 = vpop.f32.mrf.mxu1 }
 0x14c   : > { %v559_v44 = vadd.f32 %v558_v31, %v2534_v41 }
 0x14d   : > { %v878_v61 = vadd.f32 %v855_v1, %v688_v28 }
 0x14e   : > { %2027 = vmatmul.msk.bf16.gmra.mxu1 %vm402_vm2, %v1102_v10 }
 0x14f   : > { %2069 = vmatmul.msk.bf16.gmra.mxu2 %vm402_vm2, %v1292_v11  ;;  %v2806_v8 = vadd.f32 %v2753_v37, %v878_v61  ;;  %2080 = vmatmul.msk.bf16.gmra.mxu3 %vm402_vm2, %v1492_v46  ;;  %v1293_v37 = vrot.slane %v1275_v62, 2 }
 0x150   : > { %v1665_v0 = vpop.f32.mrf.mxu0 }
 0x151   : > { %v1294_v48 = vsel %vm1085_vm7, %v1291_v7, %v1293_v37 }
 0x152   : > { %v668_v55 = vpop.f32.mrf.mxu2  ;;  %v1532_v12 = vpop.f32.mrf.mxu3 }
 0x153   : > { %v689_v50 = vadd.f32 %v668_v55, %v559_v44  ;;  %v560_v40 = vpop.f32.mrf.mxu1 }
 0x154   : > { %v561_v29 = vadd.f32 %v560_v40, %v2548_v24 }
 0x155   : > { %v879_v35 = vadd.f32 %v858_v3, %v689_v50 }
 0x157   : > { %v2812_v1 = vadd.f32 %v2768_v52, %v879_v35 }
 0x158   : > { %v1667_v14 = vpop.f32.mrf.mxu0 }
 0x15a   : > { %v670_v4 = vpop.f32.mrf.mxu2  ;;  %v1534_v2 = vpop.f32.mrf.mxu3 }
 0x15b   : > { %v690_v41 = vadd.f32 %v670_v4, %v561_v29  ;;  %v1144_v21 = vpop.f32.mrf.mxu1 }
 0x15c   : > { %v1189_v24 = vadd.f32 %v1144_v21, %v2604_v23 }
 0x15d   : > { %v880_v26 = vadd.f32 %v860_v30, %v690_v41 }
 0x15e   : > { %2028 = vmatmul.msk.bf16.gmra.mxu1 %vm402_vm2, %v1104_v42 }
 0x15f   : > { %2070 = vmatmul.msk.bf16.gmra.mxu2 %vm402_vm2, %v1294_v48  ;;  %v2822_v18 = vadd.f32 %v2782_v49, %v880_v26 }
 0x160   : > { %v1670_v22 = vpop.f32.mrf.mxu0 }
 0x162   : > { %v1334_v52 = vpop.f32.mrf.mxu2  ;;  %v1537_v19 = vpop.f32.mrf.mxu3 }
 0x163   : > { %v1379_v43 = vadd.f32 %v1334_v52, %v1189_v24  ;;  %v1146_v3 = vpop.f32.mrf.mxu1 }
 0x164   : > { %v1190_v49 = vadd.f32 %v1146_v3, %v2622_v51 }
 0x165   : > { %v1577_v27 = vadd.f32 %v1532_v12, %v1379_v43 }
 0x167   : > { %v1705_v16 = vadd.f32 %v1660_v34, %v1577_v27 }
 0x168   : > { %v1672_v61 = vpop.f32.mrf.mxu0 }
 0x169   : > { %v1727_v23 = vadd.f32 %v2828_v60, %v1705_v16 }
 0x16a   : > { %v1336_v45 = vpop.f32.mrf.mxu2  ;;  %v1539_v56 = vpop.f32.mrf.mxu3 }
 0x16b   : > { %1746 = vst.msk [vmem:[%s2833_s4] sm:$0xff] %vm1745_vm8, %v1727_v23  ;;  %v1380_v15 = vadd.f32 %v1336_v45, %v1190_v49  ;;  %v1149_v7 = vpop.f32.mrf.mxu1 }
 0x16c   : > { %v1191_v28 = vadd.f32 %v1149_v7, %v2633_v13 }
 0x16d   : > { %v1578_v34 = vadd.f32 %v1534_v2, %v1380_v15 }
 0x16f   : > { %v1706_v57 = vadd.f32 %v1662_v63, %v1578_v34 }
 0x170   : > { %v1675_v40 = vpop.f32.mrf.mxu0 }
 0x171   : > { %v1728_v38 = vadd.f32 %v2828_v60, %v1706_v57 }
 0x172   : > { %v1339_v30 = vpop.f32.mrf.mxu2  ;;  %v1542_v10 = vpop.f32.mrf.mxu3 }
 0x173   : > { %1747 = vst.msk [vmem:[%s2833_s4 + $0x8] sm:$0xff] %vm1745_vm8, %v1728_v38  ;;  %v1381_v31 = vadd.f32 %v1339_v30, %v1191_v28  ;;  %v1151_v51 = vpop.f32.mrf.mxu1 }
 0x174   : > { %v1192_v33 = vadd.f32 %v1151_v51, %v2650_v39 }
 0x175   : > { %v1579_v11 = vadd.f32 %v1537_v19, %v1381_v31 }
 0x177   : > { %v1707_v46 = vadd.f32 %v1665_v0, %v1579_v11 }
 0x178   : > { %v1677_v42 = vpop.f32.mrf.mxu0 }
 0x179   : > { %v1729_v59 = vadd.f32 %v2828_v60, %v1707_v46 }
 0x17a   : > { %v1341_v44 = vpop.f32.mrf.mxu2  ;;  %v1544_v55 = vpop.f32.mrf.mxu3 }
 0x17b   : > { %1748 = vst.msk [vmem:[%s2833_s4 + $0x10] sm:$0xff] %vm1745_vm8, %v1729_v59  ;;  %v1382_v63 = vadd.f32 %v1341_v44, %v1192_v33  ;;  %v1154_v13 = vpop.f32.mrf.mxu1 }
 0x17c   : > { %v1193_v35 = vadd.f32 %v1154_v13, %v2661_v54 }
 0x17d   : > { %v1580_v50 = vadd.f32 %v1539_v56, %v1382_v63 }
 0x17f   : > { %v1708_v12 = vadd.f32 %v1667_v14, %v1580_v50 }
 0x180   : > { %v1680_v16 = vpop.f32.mrf.mxu0 }
 0x181   : > { %v1730_v62 = vadd.f32 %v2828_v60, %v1708_v12 }
 0x182   : > { %v1344_v32 = vpop.f32.mrf.mxu2  ;;  %v1547_v0 = vpop.f32.mrf.mxu3 }
 0x183   : > { %1749 = vst.msk [vmem:[%s2833_s4 + $0x18] sm:$0xff] %vm1745_vm8, %v1730_v62  ;;  %v1383_v37 = vadd.f32 %v1344_v32, %v1193_v35  ;;  %v1156_v39 = vpop.f32.mrf.mxu1 }
 0x184   : > { %v1194_v2 = vadd.f32 %v1156_v39, %v2678_v47 }
 0x185   : > { %v1581_v29 = vadd.f32 %v1542_v10, %v1383_v37 }
 0x187   : > { %v1709_v4 = vadd.f32 %v1670_v22, %v1581_v29 }
 0x188   : > { %v1682_v57 = vpop.f32.mrf.mxu0 }
 0x189   : > { %v1731_v41 = vadd.f32 %v2828_v60, %v1709_v4 }
 0x18a   : > { %v1346_v21 = vpop.f32.mrf.mxu2  ;;  %v1549_v26 = vpop.f32.mrf.mxu3 }
 0x18b   : > { %1750 = vst.msk [vmem:[%s2833_s4 + $0x20] sm:$0xff] %vm1745_vm8, %v1731_v41  ;;  %v1384_v48 = vadd.f32 %v1346_v21, %v1194_v2  ;;  %v1159_v54 = vpop.f32.mrf.mxu1 }
 0x18c   : > { %v1195_v43 = vadd.f32 %v1159_v54, %v2689_v25 }
 0x18d   : > { %v1582_v24 = vadd.f32 %v1544_v55, %v1384_v48 }
 0x18f   : > { %v1710_v52 = vadd.f32 %v1672_v61, %v1582_v24 }
 0x190   : > { %v1685_v46 = vpop.f32.mrf.mxu0 }
 0x191   : > { %v1732_v14 = vadd.f32 %v2828_v60, %v1710_v52 }
 0x192   : > { %v1349_v19 = vpop.f32.mrf.mxu2  ;;  %v1552_v27 = vpop.f32.mrf.mxu3 }
 0x193   : > { %1751 = vst.msk [vmem:[%s2833_s4 + $0x28] sm:$0xff] %vm1745_vm8, %v1732_v14  ;;  %v1385_v3 = vadd.f32 %v1349_v19, %v1195_v43  ;;  %v1161_v47 = vpop.f32.mrf.mxu1 }
 0x194   : > { %v1196_v15 = vadd.f32 %v1161_v47, %v2705_v5 }
 0x195   : > { %v1583_v23 = vadd.f32 %v1547_v0, %v1385_v3 }
 0x197   : > { %v1711_v49 = vadd.f32 %v1675_v40, %v1583_v23 }
 0x198   : > { %v1687_v35 = vpop.f32.mrf.mxu0 }
 0x199   : > { %v1733_v45 = vadd.f32 %v2828_v60, %v1711_v49 }
 0x19a   : > { %v1351_v56 = vpop.f32.mrf.mxu2  ;;  %v1554_v25 = vpop.f32.mrf.mxu3 }
 0x19b   : > { %1752 = vst.msk [vmem:[%s2833_s4 + $0x30] sm:$0xff] %vm1745_vm8, %v1733_v45  ;;  %v1386_v7 = vadd.f32 %v1351_v56, %v1196_v15  ;;  %v1164_v22 = vpop.f32.mrf.mxu1 }
 0x19c   : > { %v1197_v30 = vadd.f32 %v1164_v22, %v2716_v6 }
 0x19d   : > { %v1584_v34 = vadd.f32 %v1549_v26, %v1386_v7 }
 0x19f   : > { %v1712_v38 = vadd.f32 %v1677_v42, %v1584_v34 }
 0x1a1   : > { %v1734_v28 = vadd.f32 %v2828_v60, %v1712_v38 }
 0x1a2   : > { %v1354_v31 = vpop.f32.mrf.mxu2  ;;  %v1557_v11 = vpop.f32.mrf.mxu3 }
 0x1a3   : > { %1753 = vst.msk [vmem:[%s2833_s4 + $0x38] sm:$0xff] %vm1745_vm8, %v1734_v28  ;;  %v1387_v10 = vadd.f32 %v1354_v31, %v1197_v30  ;;  %v1166_v51 = vpop.f32.mrf.mxu1 }
 0x1a4   : > { %v1198_v33 = vadd.f32 %v1166_v51, %v2733_v20 }
 0x1a5   : > { %v1585_v5 = vadd.f32 %v1552_v27, %v1387_v10 }
 0x1a7   : > { %v1713_v61 = vadd.f32 %v1680_v16, %v1585_v5 }
 0x1a9   : > { %v1735_v59 = vadd.f32 %v2828_v60, %v1713_v61 }
 0x1aa   : > { %v1356_v44 = vpop.f32.mrf.mxu2  ;;  %v1559_v50 = vpop.f32.mrf.mxu3 }
 0x1ab   : > { %1754 = vst.msk [vmem:[%s2833_s4 + $0x40] sm:$0xff] %vm1745_vm8, %v1735_v59  ;;  %v1388_v63 = vadd.f32 %v1356_v44, %v1198_v33  ;;  %v1169_v55 = vpop.f32.mrf.mxu1 }
 0x1ac   : > { %v1199_v40 = vadd.f32 %v1169_v55, %v2744_v9  ;;  %v1690_v9 = vpop.f32.mrf.mxu0 }
 0x1ad   : > { %v1586_v6 = vadd.f32 %v1554_v25, %v1388_v63 }
 0x1af   : > { %v1714_v13 = vadd.f32 %v1682_v57, %v1586_v6 }
 0x1b1   : > { %v1736_v12 = vadd.f32 %v2828_v60, %v1714_v13 }
 0x1b2   : > { %v1359_v62 = vpop.f32.mrf.mxu2  ;;  %v1562_v41 = vpop.f32.mrf.mxu3 }
 0x1b3   : > { %1755 = vst.msk [vmem:[%s2833_s4 + $0x48] sm:$0xff] %vm1745_vm8, %v1736_v12  ;;  %v1389_v32 = vadd.f32 %v1359_v62, %v1199_v40  ;;  %v1171_v37 = vpop.f32.mrf.mxu1 }
 0x1b4   : > { %v1200_v29 = vadd.f32 %v1171_v37, %v2761_v53  ;;  %v1692_v19 = vpop.f32.mrf.mxu0 }
 0x1b5   : > { %v1587_v20 = vadd.f32 %v1557_v11, %v1389_v32 }
 0x1b7   : > { %v1715_v0 = vadd.f32 %v1685_v46, %v1587_v20 }
 0x1b9   : > { %v1737_v39 = vadd.f32 %v2828_v60, %v1715_v0 }
 0x1ba   : > { %v1361_v4 = vpop.f32.mrf.mxu2  ;;  %v1564_v53 = vpop.f32.mrf.mxu3 }
 0x1bb   : > { %1756 = vst.msk [vmem:[%s2833_s4 + $0x50] sm:$0xff] %vm1745_vm8, %v1737_v39  ;;  %v1390_v2 = vadd.f32 %v1361_v4, %v1200_v29  ;;  %v1174_v21 = vpop.f32.mrf.mxu1 }
 0x1bc   : > { %v1201_v54 = vadd.f32 %v1174_v21, %v2773_v17  ;;  %v1695_v56 = vpop.f32.mrf.mxu0 }
 0x1bd   : > { %v1588_v42 = vadd.f32 %v1559_v50, %v1390_v2 }
 0x1bf   : > { %v1716_v48 = vadd.f32 %v1687_v35, %v1588_v42 }
 0x1c1   : > { %v1738_v26 = vadd.f32 %v2828_v60, %v1716_v48 }
 0x1c2   : > { %v1364_v24 = vpop.f32.mrf.mxu2  ;;  %v1567_v45 = vpop.f32.mrf.mxu3 }
 0x1c3   : > { %1757 = vst.msk [vmem:[%s2833_s4 + $0x58] sm:$0xff] %vm1745_vm8, %v1738_v26  ;;  %v1391_v52 = vadd.f32 %v1364_v24, %v1201_v54  ;;  %v1176_v14 = vpop.f32.mrf.mxu1 }
 0x1c4   : > { %v1202_v47 = vadd.f32 %v1176_v14, %v2787_v36  ;;  %v1697_v10 = vpop.f32.mrf.mxu0 }
 0x1c5   : > { %v1589_v43 = vadd.f32 %v1562_v41, %v1391_v52 }
 0x1c7   : > { %v1717_v3 = vadd.f32 %v1690_v9, %v1589_v43 }
 0x1c9   : > { %v1739_v27 = vadd.f32 %v2828_v60, %v1717_v3 }
 0x1ca   : > { %v1366_v16 = vpop.f32.mrf.mxu2  ;;  %v1569_v28 = vpop.f32.mrf.mxu3 }
 0x1cb   : > { %1758 = vst.msk [vmem:[%s2833_s4 + $0x60] sm:$0xff] %vm1745_vm8, %v1739_v27  ;;  %v1392_v23 = vadd.f32 %v1366_v16, %v1202_v47  ;;  %v1179_v49 = vpop.f32.mrf.mxu1 }
 0x1cc   : > { %v1203_v22 = vadd.f32 %v1179_v49, %v2793_v58 }
 0x1cd   : > { %v1590_v17 = vadd.f32 %v1564_v53, %v1392_v23 }
 0x1cf   : > { %v1718_v15 = vadd.f32 %v1692_v19, %v1590_v17 }
 0x1d1   : > { %v1740_v7 = vadd.f32 %v2828_v60, %v1718_v15 }
 0x1d2   : > { %v1369_v25 = vpop.f32.mrf.mxu2  ;;  %v1572_v33 = vpop.f32.mrf.mxu3 }
 0x1d3   : > { %1759 = vst.msk [vmem:[%s2833_s4 + $0x68] sm:$0xff] %vm1745_vm8, %v1740_v7  ;;  %v1393_v34 = vadd.f32 %v1369_v25, %v1203_v22  ;;  %v1181_v57 = vpop.f32.mrf.mxu1 }
 0x1d4   : > { %v1204_v31 = vadd.f32 %v1181_v57, %v2806_v8  ;;  %v1700_v8 = vpop.f32.mrf.mxu0 }
 0x1d5   : > { %v1591_v36 = vadd.f32 %v1567_v45, %v1393_v34 }
 0x1d7   : > { %v1719_v38 = vadd.f32 %v1695_v56, %v1591_v36 }
 0x1d9   : > { %v1741_v30 = vadd.f32 %v2828_v60, %v1719_v38 }
 0x1da   : > { %v1371_v51 = vpop.f32.mrf.mxu2  ;;  %v1574_v35 = vpop.f32.mrf.mxu3 }
 0x1db   : > { %1760 = vst.msk [vmem:[%s2833_s4 + $0x70] sm:$0xff] %vm1745_vm8, %v1741_v30  ;;  %v1394_v5 = vadd.f32 %v1371_v51, %v1204_v31  ;;  %v1184_v11 = vpop.f32.mrf.mxu1 }
 0x1dc   : > { %v1205_v59 = vadd.f32 %v1184_v11, %v2812_v1  ;;  %v1702_v32 = vpop.f32.mrf.mxu0 }
 0x1dd   : > { %v1592_v58 = vadd.f32 %v1569_v28, %v1394_v5 }
 0x1df   : > { %v1720_v61 = vadd.f32 %v1697_v10, %v1592_v58 }
 0x1e1   : > { %v1742_v46 = vadd.f32 %v2828_v60, %v1720_v61 }
 0x1e2   : > { %v1374_v44 = vpop.f32.mrf.mxu2 }
 0x1e3   : > { %1761 = vst.msk [vmem:[%s2833_s4 + $0x78] sm:$0xff] %vm1745_vm8, %v1742_v46  ;;  %v1395_v63 = vadd.f32 %v1374_v44, %v1205_v59  ;;  %v1186_v6 = vpop.f32.mrf.mxu1 }
 0x1e4   : > { %v1206_v12 = vadd.f32 %v1186_v6, %v2822_v18 }
 0x1e5   : > { %v1593_v55 = vadd.f32 %v1572_v33, %v1395_v63 }
 0x1e7   : > { %v1721_v13 = vadd.f32 %v1700_v8, %v1593_v55 }
 0x1e9   : > { %v1743_v50 = vadd.f32 %v2828_v60, %v1721_v13 }
 0x1ea   : > { %v1376_v40 = vpop.f32.mrf.mxu2 }
 0x1eb   : > { %1762 = vst.msk [vmem:[%s2833_s4 + $0x80] sm:$0xff] %vm1745_vm8, %v1743_v50  ;;  %v1396_v62 = vadd.f32 %v1376_v40, %v1206_v12 }
 0x1ed   : > { %v1594_v1 = vadd.f32 %v1574_v35, %v1396_v62 }
 0x1ef   : > { %v1722_v37 = vadd.f32 %v1702_v32, %v1594_v1 }
 0x1f1   : > { %v1744_v20 = vadd.f32 %v2828_v60, %v1722_v37 }
 0x1f3   : > { %1763 = vst.msk [vmem:[%s2833_s4 + $0x88] sm:$0xff] %vm1745_vm8, %v1744_v20 }
 0x1f4 PF: > { %s13_s16 = sadd.s32 1, %s2209_s16   ;;  %s2925_s12 = smov %s2201_s14 }
 0x1f5   : > { %p10_p8 = scmp.ge.s32.totalorder %s13_s16, 6   ;;  %s2926_s13 = smov %s2205_s15 }
 0x1f6   : > { %s2927_s14 = smov %s2930_s17  ;;  %s2928_s15 = smov %s2934_s18 }
 0x1f7   :  { %12 = sbr.rel (!%p10_p8) target bundleno = 3 (0x3), region = 76 }

</bundles_post_ra>
